<compile_context>
chip_gen: v7x
topology: tpu7x:2x2x1
jax: 0.10.0
libtpu: 0.0.40
codegen_flags: <defaults>
</compile_context>

<pallas_src>
import math

import jax
import jax.numpy as jnp
from jax.experimental import pallas as pl
from jax.experimental.pallas import tpu as pltpu

# ---- small synthetic config (GPT-style), chosen lane-dense (C, 3C, 4C % 128 == 0) ----
BATCH = 2
SEQ = 32
N_EMBD = 128
N_HEAD = 4
HEAD_DIM = N_EMBD // N_HEAD
LN_EPS = 1e-5
NEG_INF = -1e30
GELU_C = math.sqrt(2.0 / math.pi)


# ---------------------------------------------------------------------------
# Pallas kernel: one transformer Block for one batch element per grid step
# ---------------------------------------------------------------------------
def block_kernel(x_ref,
                 ln1_g_ref, ln1_b_ref,
                 wqkv_ref, bqkv_ref,
                 wproj_ref, bproj_ref,
                 ln2_g_ref, ln2_b_ref,
                 wfc_ref, bfc_ref,
                 wmp_ref, bmp_ref,
                 o_ref):
    x = x_ref[0]                                           # (T, C) f32
    T, C = x.shape
    H, D = N_HEAD, HEAD_DIM
    bf16 = jnp.bfloat16
    f32 = jnp.float32

    def layernorm(v, g, b):
        # single-sweep variance: E[x^2] - mean^2 (two independent reductions,
        # no serial dependency between them)
        mu = jnp.mean(v, axis=-1, keepdims=True)
        ms = jnp.mean(v * v, axis=-1, keepdims=True)
        var = ms - mu * mu
        return (v - mu) * jax.lax.rsqrt(var + LN_EPS) * g + b

    # ---------------- attention branch: x + attn(ln_1(x)) ----------------
    h = layernorm(x, ln1_g_ref[0], ln1_b_ref[0])           # (T, C) f32

    # Fused lane-dense QKV projection (1/sqrt(D) already folded into Q weights).
    qkv = jnp.dot(h.astype(bf16), wqkv_ref[...],
                  preferred_element_type=f32) + bqkv_ref[0]           # (T, 3C)

    q = qkv[:, :C]                                         # 128-aligned lane slices
    k = qkv[:, C:2 * C]
    v = qkv[:, 2 * C:]

    # Split heads after the fused matmul (static lane slices + major-axis stack).
    qh = jnp.stack([q[:, hh * D:(hh + 1) * D] for hh in range(H)], axis=0)  # (H,T,D)
    kh = jnp.stack([k[:, hh * D:(hh + 1) * D] for hh in range(H)], axis=0)
    vh = jnp.stack([v[:, hh * D:(hh + 1) * D] for hh in range(H)], axis=0)

    # Scores (H, T, T) — per-sequence, per-head; B never enters the score shape.
    s = jnp.einsum('htd,hsd->hts', qh.astype(bf16), kh.astype(bf16),
                   preferred_element_type=f32)

    # Causal mask generated in-kernel (a few VPU ops, no HBM bias read).
    row = jax.lax.broadcasted_iota(jnp.int32, (T, T), 0)
    col = jax.lax.broadcasted_iota(jnp.int32, (T, T), 1)
    s = jnp.where((row >= col)[None, :, :], s, NEG_INF)

    m = jnp.max(s, axis=-1, keepdims=True)
    p = jnp.exp(s - m)                                     # f32, un-normalized
    denom = jnp.sum(p, axis=-1, keepdims=True)
    attn = jnp.einsum('hts,hsd->htd', p.astype(bf16), vh.astype(bf16),
                      preferred_element_type=f32)
    attn = attn / denom                                    # exact normalization

    # Head concat on the lane axis + single output projection (K = H*D = C).
    y_cat = jnp.concatenate([attn[hh] for hh in range(H)], axis=-1)   # (T, C)
    y = jnp.dot(y_cat.astype(bf16), wproj_ref[...],
                preferred_element_type=f32) + bproj_ref[0]
    x1 = x + y

    # ---------------- MLP branch: x1 + mlp(ln_2(x1)) ----------------
    h2 = layernorm(x1, ln2_g_ref[0], ln2_b_ref[0])
    f = jnp.dot(h2.astype(bf16), wfc_ref[...],
                preferred_element_type=f32) + bfc_ref[0]              # (T, 4C)
    # GELU, tanh approximation — matches nn.GELU(approximate='tanh'); f32 math.
    g = 0.5 * f * (1.0 + jnp.tanh(GELU_C * (f + 0.044715 * f * f * f)))
    mlp = jnp.dot(g.astype(bf16), wmp_ref[...],
                  preferred_element_type=f32) + bmp_ref[0]

    o_ref[0] = x1 + mlp


# ---------------------------------------------------------------------------
# Wrapper: fold attention scale into Q weights, cast matmul weights to bf16
# ---------------------------------------------------------------------------
def _prepare_kernel_inputs(params):
    (ln1_g, ln1_b, w_qkv, b_qkv, w_ap, b_ap,
     ln2_g, ln2_b, w_fc, b_fc, w_mp, b_mp) = params
    C = N_EMBD
    bf, f32 = jnp.bfloat16, jnp.float32

    # Fold 1/sqrt(head_dim) into the Q third of c_attn (weights + bias): free.
    scale = 1.0 / math.sqrt(HEAD_DIM)
    qscale = jnp.concatenate(
        [jnp.full((C,), scale, f32), jnp.ones((2 * C,), f32)])
    w_qkv_s = w_qkv.astype(f32) * qscale[None, :]
    b_qkv_s = b_qkv.astype(f32) * qscale[None, :]

    return (
        ln1_g.astype(f32), ln1_b.astype(f32),
        w_qkv_s.astype(bf), b_qkv_s.astype(f32),
        w_ap.astype(bf), b_ap.astype(f32),
        ln2_g.astype(f32), ln2_b.astype(f32),
        w_fc.astype(bf), b_fc.astype(f32),
        w_mp.astype(bf), b_mp.astype(f32),
    )


@jax.jit
def transformer_block(x, params):
    B, T, C = x.shape
    kin = _prepare_kernel_inputs(params)

    x_spec = pl.BlockSpec((1, T, C), lambda b: (b, 0, 0))
    # Weights/biases: full-array blocks with constant index map -> DMA'd once,
    # resident in VMEM across the whole (parallel) batch grid.
    w_specs = [pl.BlockSpec(p.shape, lambda b: (0, 0)) for p in kin]

    out = pl.pallas_call(
        block_kernel,
        out_shape=jax.ShapeDtypeStruct((B, T, C), jnp.float32),
        grid=(B,),
        in_specs=[x_spec] + w_specs,
        out_specs=pl.BlockSpec((1, T, C), lambda b: (b, 0, 0)),
        compiler_params=pltpu.CompilerParams(
            dimension_semantics=("parallel",)),
    )(x.astype(jnp.float32), *kin)
    # TODO(synk): at real GPT sizes (T=1024, C=768) add flash-style KV tiling
    # (q-tile "parallel", kv-tile "arbitrary" with online-softmax scratch) and
    # re-budget tile sizes per generation (64 MiB VMEM on v7x vs 128 MiB on
    # v5e/v6e, vmem_limit_bytes set explicitly).
    return out


# ---------------------------------------------------------------------------
# Deterministic parameter init (synthetic — matches shapes of the PyTorch module)
# ---------------------------------------------------------------------------
def init_params(key, C):
    ks = jax.random.split(key, 12)
    n = lambda k, shape, s=0.02: (s * jax.random.normal(k, shape)).astype(jnp.float32)
    return (
        1.0 + n(ks[0], (1, C)),          # ln_1 weight
        n(ks[1], (1, C)),                # ln_1 bias
        n(ks[2], (C, 3 * C)),            # c_attn weight (in, out)
        n(ks[3], (1, 3 * C)),            # c_attn bias
        n(ks[4], (C, C)),                # attn c_proj weight
        n(ks[5], (1, C)),                # attn c_proj bias
        1.0 + n(ks[6], (1, C)),          # ln_2 weight
        n(ks[7], (1, C)),                # ln_2 bias
        n(ks[8], (C, 4 * C)),            # mlp c_fc weight
        n(ks[9], (1, 4 * C)),            # mlp c_fc bias
        n(ks[10], (4 * C, C)),           # mlp c_proj weight
        n(ks[11], (1, C)),               # mlp c_proj bias
    )


# ---------------------------------------------------------------------------
# Pure-JAX f32 reference (mirrors the PyTorch forward) for validation
# ---------------------------------------------------------------------------
def block_ref(x, params):
    (ln1_g, ln1_b, w_qkv, b_qkv, w_ap, b_ap,
     ln2_g, ln2_b, w_fc, b_fc, w_mp, b_mp) = params

    def ln(v, g, b):
        mu = v.mean(-1, keepdims=True)
        var = ((v - mu) ** 2).mean(-1, keepdims=True)
        return (v - mu) / jnp.sqrt(var + LN_EPS) * g[0] + b[0]

    B, T, C = x.shape
    h = ln(x, ln1_g, ln1_b)
    qkv = h @ w_qkv + b_qkv[0]
    q, k, v = jnp.split(qkv, 3, axis=-1)
    heads = lambda t: t.reshape(B, T, N_HEAD, HEAD_DIM).transpose(0, 2, 1, 3)
    q, k, v = heads(q), heads(k), heads(v)
    s = jnp.einsum('bhqd,bhkd->bhqk', q, k) / math.sqrt(HEAD_DIM)
    mask = jnp.tril(jnp.ones((T, T), bool))
    s = jnp.where(mask, s, NEG_INF)
    p = jax.nn.softmax(s, axis=-1)
    y = jnp.einsum('bhqk,bhkd->bhqd', p, v).transpose(0, 2, 1, 3).reshape(B, T, C)
    y = y @ w_ap + b_ap[0]
    x1 = x + y
    h2 = ln(x1, ln2_g, ln2_b)
    f = h2 @ w_fc + b_fc[0]
    g = 0.5 * f * (1.0 + jnp.tanh(GELU_C * (f + 0.044715 * f ** 3)))
    return x1 + g @ w_mp + b_mp[0]


if __name__ == "__main__":
    key = jax.random.PRNGKey(0)
    kx, kp = jax.random.split(key)
    x = jax.random.normal(kx, (BATCH, SEQ, N_EMBD), dtype=jnp.float32)
    params = init_params(kp, N_EMBD)

    out = transformer_block(x, params)
    out = jax.block_until_ready(out)

    ref = block_ref(x, params)
    assert out.shape == (BATCH, SEQ, N_EMBD)
    # bf16 matmul operands (f32 accumulation) -> loosened tolerance vs f32 ref.
    assert jnp.allclose(out, ref, atol=2e-2, rtol=2e-2), \
        f"max err {jnp.max(jnp.abs(out - ref))}"
    print("KERNEL_OK")
</pallas_src>

<mosaic_0001>
module attributes {stable_mosaic.version = 11 : i64} {
  func.func @block_kernel(%arg0: i32, %arg1: memref<1x32x128xf32, #tpu.memory_space<vmem>>, %arg2: memref<1x128xf32, #tpu.memory_space<vmem>>, %arg3: memref<1x128xf32, #tpu.memory_space<vmem>>, %arg4: memref<128x384xbf16, #tpu.memory_space<vmem>>, %arg5: memref<1x384xf32, #tpu.memory_space<vmem>>, %arg6: memref<128x128xbf16, #tpu.memory_space<vmem>>, %arg7: memref<1x128xf32, #tpu.memory_space<vmem>>, %arg8: memref<1x128xf32, #tpu.memory_space<vmem>>, %arg9: memref<1x128xf32, #tpu.memory_space<vmem>>, %arg10: memref<128x512xbf16, #tpu.memory_space<vmem>>, %arg11: memref<1x512xf32, #tpu.memory_space<vmem>>, %arg12: memref<512x128xbf16, #tpu.memory_space<vmem>>, %arg13: memref<1x128xf32, #tpu.memory_space<vmem>>, %arg14: memref<1x32x128xf32, #tpu.memory_space<vmem>>) attributes {dimension_semantics = [#tpu.dimension_semantics<parallel>], iteration_bounds = array<i64: 2>, scalar_prefetch = 0 : i64, scratch_operands = 0 : i64, tpu.core_type = #tpu.core_type<tc>, window_params = [{transform_indices = @transform_0, window_bounds = array<i64: 1, 32, 128>}, {pipeline_mode = #tpu.pipeline_mode<synchronous>, transform_indices = @transform_1, window_bounds = array<i64: 1, 128>}, {pipeline_mode = #tpu.pipeline_mode<synchronous>, transform_indices = @transform_2, window_bounds = array<i64: 1, 128>}, {pipeline_mode = #tpu.pipeline_mode<synchronous>, transform_indices = @transform_3, window_bounds = array<i64: 128, 384>}, {pipeline_mode = #tpu.pipeline_mode<synchronous>, transform_indices = @transform_4, window_bounds = array<i64: 1, 384>}, {pipeline_mode = #tpu.pipeline_mode<synchronous>, transform_indices = @transform_5, window_bounds = array<i64: 128, 128>}, {pipeline_mode = #tpu.pipeline_mode<synchronous>, transform_indices = @transform_6, window_bounds = array<i64: 1, 128>}, {pipeline_mode = #tpu.pipeline_mode<synchronous>, transform_indices = @transform_7, window_bounds = array<i64: 1, 128>}, {pipeline_mode = #tpu.pipeline_mode<synchronous>, transform_indices = @transform_8, window_bounds = array<i64: 1, 128>}, {pipeline_mode = #tpu.pipeline_mode<synchronous>, transform_indices = @transform_9, window_bounds = array<i64: 128, 512>}, {pipeline_mode = #tpu.pipeline_mode<synchronous>, transform_indices = @transform_10, window_bounds = array<i64: 1, 512>}, {pipeline_mode = #tpu.pipeline_mode<synchronous>, transform_indices = @transform_11, window_bounds = array<i64: 512, 128>}, {pipeline_mode = #tpu.pipeline_mode<synchronous>, transform_indices = @transform_12, window_bounds = array<i64: 1, 128>}, {transform_indices = @transform_13, window_bounds = array<i64: 1, 32, 128>}]} {
    %c0 = arith.constant 0 : index
    %c0_0 = arith.constant 0 : index
    %c0_1 = arith.constant 0 : index
    %0 = vector.load %arg1[%c0, %c0_0, %c0_1] : memref<1x32x128xf32, #tpu.memory_space<vmem>>, vector<1x32x128xf32>
    %1 = vector.shape_cast %0 : vector<1x32x128xf32> to vector<32x128xf32>
    %c0_2 = arith.constant 0 : index
    %c0_3 = arith.constant 0 : index
    %2 = vector.load %arg2[%c0_2, %c0_3] : memref<1x128xf32, #tpu.memory_space<vmem>>, vector<1x128xf32>
    %3 = vector.shape_cast %2 : vector<1x128xf32> to vector<128xf32>
    %c0_4 = arith.constant 0 : index
    %c0_5 = arith.constant 0 : index
    %4 = vector.load %arg3[%c0_4, %c0_5] : memref<1x128xf32, #tpu.memory_space<vmem>>, vector<1x128xf32>
    %5 = vector.shape_cast %4 : vector<1x128xf32> to vector<128xf32>
    %cst = arith.constant dense<0.000000e+00> : vector<32xf32>
    %6 = vector.multi_reduction <add>, %1, %cst [1] : vector<32x128xf32> to vector<32xf32>
    %7 = vector.shape_cast %6 : vector<32xf32> to vector<32x1xf32>
    %cst_6 = arith.constant 1.280000e+02 : f32
    %8 = vector.broadcast %cst_6 : f32 to vector<32x1xf32>
    %9 = arith.divf %7, %8 : vector<32x1xf32>
    %10 = arith.mulf %1, %1 : vector<32x128xf32>
    %cst_7 = arith.constant dense<0.000000e+00> : vector<32xf32>
    %11 = vector.multi_reduction <add>, %10, %cst_7 [1] : vector<32x128xf32> to vector<32xf32>
    %12 = vector.shape_cast %11 : vector<32xf32> to vector<32x1xf32>
    %cst_8 = arith.constant 1.280000e+02 : f32
    %13 = vector.broadcast %cst_8 : f32 to vector<32x1xf32>
    %14 = arith.divf %12, %13 : vector<32x1xf32>
    %15 = arith.mulf %9, %9 : vector<32x1xf32>
    %16 = arith.subf %14, %15 : vector<32x1xf32>
    %17 = vector.broadcast %9 : vector<32x1xf32> to vector<32x128xf32>
    %18 = arith.subf %1, %17 : vector<32x128xf32>
    %cst_9 = arith.constant 9.99999974E-6 : f32
    %19 = vector.broadcast %cst_9 : f32 to vector<32x1xf32>
    %20 = arith.addf %16, %19 : vector<32x1xf32>
    %21 = math.rsqrt %20 : vector<32x1xf32>
    %22 = vector.broadcast %21 : vector<32x1xf32> to vector<32x128xf32>
    %23 = arith.mulf %18, %22 : vector<32x128xf32>
    %24 = vector.shape_cast %3 : vector<128xf32> to vector<1x128xf32>
    %25 = vector.broadcast %24 : vector<1x128xf32> to vector<32x128xf32>
    %26 = arith.mulf %23, %25 : vector<32x128xf32>
    %27 = vector.shape_cast %5 : vector<128xf32> to vector<1x128xf32>
    %28 = vector.broadcast %27 : vector<1x128xf32> to vector<32x128xf32>
    %29 = arith.addf %26, %28 : vector<32x128xf32>
    %30 = arith.truncf %29 : vector<32x128xf32> to vector<32x128xbf16>
    %c0_10 = arith.constant 0 : index
    %c0_11 = arith.constant 0 : index
    %31 = vector.load %arg4[%c0_10, %c0_11] : memref<128x384xbf16, #tpu.memory_space<vmem>>, vector<128x384xbf16>
    %cst_12 = arith.constant dense<0.000000e+00> : vector<32x384xf32>
    %32 = tpu.matmul %30, %31, %cst_12 {dimension_numbers = #tpu.dot_dimension_numbers<[1], [0], [0], [1], [0, 0, 1, 1], [], []>} : vector<32x128xbf16>, vector<128x384xbf16>, vector<32x384xf32> -> vector<32x384xf32>
    %c0_13 = arith.constant 0 : index
    %c0_14 = arith.constant 0 : index
    %33 = vector.load %arg5[%c0_13, %c0_14] : memref<1x384xf32, #tpu.memory_space<vmem>>, vector<1x384xf32>
    %34 = vector.shape_cast %33 : vector<1x384xf32> to vector<384xf32>
    %35 = vector.shape_cast %34 : vector<384xf32> to vector<1x384xf32>
    %36 = vector.broadcast %35 : vector<1x384xf32> to vector<32x384xf32>
    %37 = arith.addf %32, %36 : vector<32x384xf32>
    %38 = vector.extract_strided_slice %37 {offsets = [0, 0], sizes = [32, 128], strides = [1, 1]} : vector<32x384xf32> to vector<32x128xf32>
    %39 = vector.extract_strided_slice %37 {offsets = [0, 128], sizes = [32, 128], strides = [1, 1]} : vector<32x384xf32> to vector<32x128xf32>
    %40 = vector.extract_strided_slice %37 {offsets = [0, 256], sizes = [32, 128], strides = [1, 1]} : vector<32x384xf32> to vector<32x128xf32>
    %41 = vector.extract_strided_slice %38 {offsets = [0, 0], sizes = [32, 32], strides = [1, 1]} : vector<32x128xf32> to vector<32x32xf32>
    %42 = vector.extract_strided_slice %38 {offsets = [0, 32], sizes = [32, 32], strides = [1, 1]} : vector<32x128xf32> to vector<32x32xf32>
    %43 = vector.extract_strided_slice %38 {offsets = [0, 64], sizes = [32, 32], strides = [1, 1]} : vector<32x128xf32> to vector<32x32xf32>
    %44 = vector.extract_strided_slice %38 {offsets = [0, 96], sizes = [32, 32], strides = [1, 1]} : vector<32x128xf32> to vector<32x32xf32>
    %45 = vector.shape_cast %41 : vector<32x32xf32> to vector<1x32x32xf32>
    %46 = vector.shape_cast %42 : vector<32x32xf32> to vector<1x32x32xf32>
    %47 = vector.shape_cast %43 : vector<32x32xf32> to vector<1x32x32xf32>
    %48 = vector.shape_cast %44 : vector<32x32xf32> to vector<1x32x32xf32>
    %49 = tpu.concatenate %45, %46, %47, %48 in 0 : vector<1x32x32xf32>, vector<1x32x32xf32>, vector<1x32x32xf32>, vector<1x32x32xf32> -> vector<4x32x32xf32>
    %50 = vector.extract_strided_slice %39 {offsets = [0, 0], sizes = [32, 32], strides = [1, 1]} : vector<32x128xf32> to vector<32x32xf32>
    %51 = vector.extract_strided_slice %39 {offsets = [0, 32], sizes = [32, 32], strides = [1, 1]} : vector<32x128xf32> to vector<32x32xf32>
    %52 = vector.extract_strided_slice %39 {offsets = [0, 64], sizes = [32, 32], strides = [1, 1]} : vector<32x128xf32> to vector<32x32xf32>
    %53 = vector.extract_strided_slice %39 {offsets = [0, 96], sizes = [32, 32], strides = [1, 1]} : vector<32x128xf32> to vector<32x32xf32>
    %54 = vector.shape_cast %50 : vector<32x32xf32> to vector<1x32x32xf32>
    %55 = vector.shape_cast %51 : vector<32x32xf32> to vector<1x32x32xf32>
    %56 = vector.shape_cast %52 : vector<32x32xf32> to vector<1x32x32xf32>
    %57 = vector.shape_cast %53 : vector<32x32xf32> to vector<1x32x32xf32>
    %58 = tpu.concatenate %54, %55, %56, %57 in 0 : vector<1x32x32xf32>, vector<1x32x32xf32>, vector<1x32x32xf32>, vector<1x32x32xf32> -> vector<4x32x32xf32>
    %59 = vector.extract_strided_slice %40 {offsets = [0, 0], sizes = [32, 32], strides = [1, 1]} : vector<32x128xf32> to vector<32x32xf32>
    %60 = vector.extract_strided_slice %40 {offsets = [0, 32], sizes = [32, 32], strides = [1, 1]} : vector<32x128xf32> to vector<32x32xf32>
    %61 = vector.extract_strided_slice %40 {offsets = [0, 64], sizes = [32, 32], strides = [1, 1]} : vector<32x128xf32> to vector<32x32xf32>
    %62 = vector.extract_strided_slice %40 {offsets = [0, 96], sizes = [32, 32], strides = [1, 1]} : vector<32x128xf32> to vector<32x32xf32>
    %63 = vector.shape_cast %59 : vector<32x32xf32> to vector<1x32x32xf32>
    %64 = vector.shape_cast %60 : vector<32x32xf32> to vector<1x32x32xf32>
    %65 = vector.shape_cast %61 : vector<32x32xf32> to vector<1x32x32xf32>
    %66 = vector.shape_cast %62 : vector<32x32xf32> to vector<1x32x32xf32>
    %67 = tpu.concatenate %63, %64, %65, %66 in 0 : vector<1x32x32xf32>, vector<1x32x32xf32>, vector<1x32x32xf32>, vector<1x32x32xf32> -> vector<4x32x32xf32>
    %68 = arith.truncf %49 : vector<4x32x32xf32> to vector<4x32x32xbf16>
    %69 = arith.truncf %58 : vector<4x32x32xf32> to vector<4x32x32xbf16>
    "tpu.trace_start"() <{level = 10 : i32, message = "htd,hsd->hts"}> : () -> ()
    %cst_15 = arith.constant dense<0.000000e+00> : vector<4x32x32xf32>
    %70 = tpu.matmul %68, %69, %cst_15 {dimension_numbers = #tpu.dot_dimension_numbers<[2], [2], [1], [1], [0, 0, 0, 1, 1, 1], [0], [0]>} : vector<4x32x32xbf16>, vector<4x32x32xbf16>, vector<4x32x32xf32> -> vector<4x32x32xf32>
    "tpu.trace_stop"() : () -> ()
    %71 = tpu.iota {dimensions = array<i32: 0>} : vector<32x32xi32>
    %72 = tpu.iota {dimensions = array<i32: 1>} : vector<32x32xi32>
    %73 = arith.cmpi sge, %71, %72 : vector<32x32xi32>
    %74 = vector.shape_cast %73 : vector<32x32xi1> to vector<1x32x32xi1>
    %cst_16 = arith.constant -1.000000e+30 : f32
    %75 = vector.shape_cast %74 : vector<1x32x32xi1> to vector<1x32x32xi1>
    %76 = vector.broadcast %75 : vector<1x32x32xi1> to vector<4x32x32xi1>
    %77 = vector.broadcast %cst_16 : f32 to vector<4x32x32xf32>
    %78 = arith.select %76, %70, %77 : vector<4x32x32xi1>, vector<4x32x32xf32>
    %cst_17 = arith.constant dense<0xFF800000> : vector<4x32xf32>
    %79 = vector.multi_reduction <maximumf>, %78, %cst_17 [2] : vector<4x32x32xf32> to vector<4x32xf32>
    %80 = vector.shape_cast %79 : vector<4x32xf32> to vector<4x32x1xf32>
    %81 = vector.broadcast %80 : vector<4x32x1xf32> to vector<4x32x32xf32>
    %82 = arith.subf %78, %81 : vector<4x32x32xf32>
    %83 = math.exp %82 : vector<4x32x32xf32>
    %cst_18 = arith.constant dense<0.000000e+00> : vector<4x32xf32>
    %84 = vector.multi_reduction <add>, %83, %cst_18 [2] : vector<4x32x32xf32> to vector<4x32xf32>
    %85 = vector.shape_cast %84 : vector<4x32xf32> to vector<4x32x1xf32>
    %86 = arith.truncf %83 : vector<4x32x32xf32> to vector<4x32x32xbf16>
    %87 = arith.truncf %67 : vector<4x32x32xf32> to vector<4x32x32xbf16>
    "tpu.trace_start"() <{level = 10 : i32, message = "hts,hsd->htd"}> : () -> ()
    %cst_19 = arith.constant dense<0.000000e+00> : vector<4x32x32xf32>
    %88 = tpu.matmul %86, %87, %cst_19 {dimension_numbers = #tpu.dot_dimension_numbers<[2], [1], [1], [2], [0, 0, 0, 1, 1, 2], [0], [0]>} : vector<4x32x32xbf16>, vector<4x32x32xbf16>, vector<4x32x32xf32> -> vector<4x32x32xf32>
    "tpu.trace_stop"() : () -> ()
    %89 = vector.broadcast %85 : vector<4x32x1xf32> to vector<4x32x32xf32>
    %90 = arith.divf %88, %89 : vector<4x32x32xf32>
    %91 = vector.extract_strided_slice %90 {offsets = [0, 0, 0], sizes = [1, 32, 32], strides = [1, 1, 1]} : vector<4x32x32xf32> to vector<1x32x32xf32>
    %92 = vector.shape_cast %91 : vector<1x32x32xf32> to vector<32x32xf32>
    %93 = vector.extract_strided_slice %90 {offsets = [1, 0, 0], sizes = [1, 32, 32], strides = [1, 1, 1]} : vector<4x32x32xf32> to vector<1x32x32xf32>
    %94 = vector.shape_cast %93 : vector<1x32x32xf32> to vector<32x32xf32>
    %95 = vector.extract_strided_slice %90 {offsets = [2, 0, 0], sizes = [1, 32, 32], strides = [1, 1, 1]} : vector<4x32x32xf32> to vector<1x32x32xf32>
    %96 = vector.shape_cast %95 : vector<1x32x32xf32> to vector<32x32xf32>
    %97 = vector.extract_strided_slice %90 {offsets = [3, 0, 0], sizes = [1, 32, 32], strides = [1, 1, 1]} : vector<4x32x32xf32> to vector<1x32x32xf32>
    %98 = vector.shape_cast %97 : vector<1x32x32xf32> to vector<32x32xf32>
    %99 = tpu.concatenate %92, %94, %96, %98 in 1 : vector<32x32xf32>, vector<32x32xf32>, vector<32x32xf32>, vector<32x32xf32> -> vector<32x128xf32>
    %100 = arith.truncf %99 : vector<32x128xf32> to vector<32x128xbf16>
    %c0_20 = arith.constant 0 : index
    %c0_21 = arith.constant 0 : index
    %101 = vector.load %arg6[%c0_20, %c0_21] : memref<128x128xbf16, #tpu.memory_space<vmem>>, vector<128x128xbf16>
    %cst_22 = arith.constant dense<0.000000e+00> : vector<32x128xf32>
    %102 = tpu.matmul %100, %101, %cst_22 {dimension_numbers = #tpu.dot_dimension_numbers<[1], [0], [0], [1], [0, 0, 1, 1], [], []>} : vector<32x128xbf16>, vector<128x128xbf16>, vector<32x128xf32> -> vector<32x128xf32>
    %c0_23 = arith.constant 0 : index
    %c0_24 = arith.constant 0 : index
    %103 = vector.load %arg7[%c0_23, %c0_24] : memref<1x128xf32, #tpu.memory_space<vmem>>, vector<1x128xf32>
    %104 = vector.shape_cast %103 : vector<1x128xf32> to vector<128xf32>
    %105 = vector.shape_cast %104 : vector<128xf32> to vector<1x128xf32>
    %106 = vector.broadcast %105 : vector<1x128xf32> to vector<32x128xf32>
    %107 = arith.addf %102, %106 : vector<32x128xf32>
    %108 = arith.addf %1, %107 : vector<32x128xf32>
    %c0_25 = arith.constant 0 : index
    %c0_26 = arith.constant 0 : index
    %109 = vector.load %arg8[%c0_25, %c0_26] : memref<1x128xf32, #tpu.memory_space<vmem>>, vector<1x128xf32>
    %110 = vector.shape_cast %109 : vector<1x128xf32> to vector<128xf32>
    %c0_27 = arith.constant 0 : index
    %c0_28 = arith.constant 0 : index
    %111 = vector.load %arg9[%c0_27, %c0_28] : memref<1x128xf32, #tpu.memory_space<vmem>>, vector<1x128xf32>
    %112 = vector.shape_cast %111 : vector<1x128xf32> to vector<128xf32>
    %cst_29 = arith.constant dense<0.000000e+00> : vector<32xf32>
    %113 = vector.multi_reduction <add>, %108, %cst_29 [1] : vector<32x128xf32> to vector<32xf32>
    %114 = vector.shape_cast %113 : vector<32xf32> to vector<32x1xf32>
    %cst_30 = arith.constant 1.280000e+02 : f32
    %115 = vector.broadcast %cst_30 : f32 to vector<32x1xf32>
    %116 = arith.divf %114, %115 : vector<32x1xf32>
    %117 = arith.mulf %108, %108 : vector<32x128xf32>
    %cst_31 = arith.constant dense<0.000000e+00> : vector<32xf32>
    %118 = vector.multi_reduction <add>, %117, %cst_31 [1] : vector<32x128xf32> to vector<32xf32>
    %119 = vector.shape_cast %118 : vector<32xf32> to vector<32x1xf32>
    %cst_32 = arith.constant 1.280000e+02 : f32
    %120 = vector.broadcast %cst_32 : f32 to vector<32x1xf32>
    %121 = arith.divf %119, %120 : vector<32x1xf32>
    %122 = arith.mulf %116, %116 : vector<32x1xf32>
    %123 = arith.subf %121, %122 : vector<32x1xf32>
    %124 = vector.broadcast %116 : vector<32x1xf32> to vector<32x128xf32>
    %125 = arith.subf %108, %124 : vector<32x128xf32>
    %cst_33 = arith.constant 9.99999974E-6 : f32
    %126 = vector.broadcast %cst_33 : f32 to vector<32x1xf32>
    %127 = arith.addf %123, %126 : vector<32x1xf32>
    %128 = math.rsqrt %127 : vector<32x1xf32>
    %129 = vector.broadcast %128 : vector<32x1xf32> to vector<32x128xf32>
    %130 = arith.mulf %125, %129 : vector<32x128xf32>
    %131 = vector.shape_cast %110 : vector<128xf32> to vector<1x128xf32>
    %132 = vector.broadcast %131 : vector<1x128xf32> to vector<32x128xf32>
    %133 = arith.mulf %130, %132 : vector<32x128xf32>
    %134 = vector.shape_cast %112 : vector<128xf32> to vector<1x128xf32>
    %135 = vector.broadcast %134 : vector<1x128xf32> to vector<32x128xf32>
    %136 = arith.addf %133, %135 : vector<32x128xf32>
    %137 = arith.truncf %136 : vector<32x128xf32> to vector<32x128xbf16>
    %c0_34 = arith.constant 0 : index
    %c0_35 = arith.constant 0 : index
    %138 = vector.load %arg10[%c0_34, %c0_35] : memref<128x512xbf16, #tpu.memory_space<vmem>>, vector<128x512xbf16>
    %cst_36 = arith.constant dense<0.000000e+00> : vector<32x512xf32>
    %139 = tpu.matmul %137, %138, %cst_36 {dimension_numbers = #tpu.dot_dimension_numbers<[1], [0], [0], [1], [0, 0, 1, 1], [], []>} : vector<32x128xbf16>, vector<128x512xbf16>, vector<32x512xf32> -> vector<32x512xf32>
    %c0_37 = arith.constant 0 : index
    %c0_38 = arith.constant 0 : index
    %140 = vector.load %arg11[%c0_37, %c0_38] : memref<1x512xf32, #tpu.memory_space<vmem>>, vector<1x512xf32>
    %141 = vector.shape_cast %140 : vector<1x512xf32> to vector<512xf32>
    %142 = vector.shape_cast %141 : vector<512xf32> to vector<1x512xf32>
    %143 = vector.broadcast %142 : vector<1x512xf32> to vector<32x512xf32>
    %144 = arith.addf %139, %143 : vector<32x512xf32>
    %cst_39 = arith.constant 5.000000e-01 : f32
    %145 = vector.broadcast %cst_39 : f32 to vector<32x512xf32>
    %146 = arith.mulf %145, %144 : vector<32x512xf32>
    %cst_40 = arith.constant 4.471500e-02 : f32
    %147 = vector.broadcast %cst_40 : f32 to vector<32x512xf32>
    %148 = arith.mulf %147, %144 : vector<32x512xf32>
    %149 = arith.mulf %148, %144 : vector<32x512xf32>
    %150 = arith.mulf %149, %144 : vector<32x512xf32>
    %151 = arith.addf %144, %150 : vector<32x512xf32>
    %cst_41 = arith.constant 0.797884583 : f32
    %152 = vector.broadcast %cst_41 : f32 to vector<32x512xf32>
    %153 = arith.mulf %152, %151 : vector<32x512xf32>
    %154 = math.tanh %153 : vector<32x512xf32>
    %cst_42 = arith.constant 1.000000e+00 : f32
    %155 = vector.broadcast %cst_42 : f32 to vector<32x512xf32>
    %156 = arith.addf %155, %154 : vector<32x512xf32>
    %157 = arith.mulf %146, %156 : vector<32x512xf32>
    %158 = arith.truncf %157 : vector<32x512xf32> to vector<32x512xbf16>
    %c0_43 = arith.constant 0 : index
    %c0_44 = arith.constant 0 : index
    %159 = vector.load %arg12[%c0_43, %c0_44] : memref<512x128xbf16, #tpu.memory_space<vmem>>, vector<512x128xbf16>
    %cst_45 = arith.constant dense<0.000000e+00> : vector<32x128xf32>
    %160 = tpu.matmul %158, %159, %cst_45 {dimension_numbers = #tpu.dot_dimension_numbers<[1], [0], [0], [1], [0, 0, 1, 1], [], []>} : vector<32x512xbf16>, vector<512x128xbf16>, vector<32x128xf32> -> vector<32x128xf32>
    %c0_46 = arith.constant 0 : index
    %c0_47 = arith.constant 0 : index
    %161 = vector.load %arg13[%c0_46, %c0_47] : memref<1x128xf32, #tpu.memory_space<vmem>>, vector<1x128xf32>
    %162 = vector.shape_cast %161 : vector<1x128xf32> to vector<128xf32>
    %163 = vector.shape_cast %162 : vector<128xf32> to vector<1x128xf32>
    %164 = vector.broadcast %163 : vector<1x128xf32> to vector<32x128xf32>
    %165 = arith.addf %160, %164 : vector<32x128xf32>
    %166 = arith.addf %108, %165 : vector<32x128xf32>
    %c0_48 = arith.constant 0 : index
    %c0_49 = arith.constant 0 : index
    %c0_50 = arith.constant 0 : index
    %167 = vector.load %arg14[%c0_48, %c0_49, %c0_50] : memref<1x32x128xf32, #tpu.memory_space<vmem>>, vector<1x32x128xf32>
    %168 = vector.shape_cast %167 : vector<1x32x128xf32> to vector<32x128xf32>
    %169 = vector.shape_cast %166 : vector<32x128xf32> to vector<1x32x128xf32>
    tpu.vector_store %arg14[%c0_48, %c0_49, %c0_50], %169 {strides = array<i32>} : memref<1x32x128xf32, #tpu.memory_space<vmem>>, vector<1x32x128xf32>,
    return
  }
  func.func @transform_0(%arg0: i32) -> (i32, i32, i32) {
    %c0_i32 = arith.constant 0 : i32
    %c0_i32_0 = arith.constant 0 : i32
    %c0_i32_1 = arith.constant 0 : i32
    return %arg0, %c0_i32, %c0_i32_0 : i32, i32, i32
  }
  func.func @transform_1(%arg0: i32) -> (i32, i32) {
    %c0_i32 = arith.constant 0 : i32
    %c0_i32_0 = arith.constant 0 : i32
    %c0_i32_1 = arith.constant 0 : i32
    return %c0_i32, %c0_i32_0 : i32, i32
  }
  func.func @transform_2(%arg0: i32) -> (i32, i32) {
    %c0_i32 = arith.constant 0 : i32
    %c0_i32_0 = arith.constant 0 : i32
    %c0_i32_1 = arith.constant 0 : i32
    return %c0_i32, %c0_i32_0 : i32, i32
  }
  func.func @transform_3(%arg0: i32) -> (i32, i32) {
    %c0_i32 = arith.constant 0 : i32
    %c0_i32_0 = arith.constant 0 : i32
    %c0_i32_1 = arith.constant 0 : i32
    return %c0_i32, %c0_i32_0 : i32, i32
  }
  func.func @transform_4(%arg0: i32) -> (i32, i32) {
    %c0_i32 = arith.constant 0 : i32
    %c0_i32_0 = arith.constant 0 : i32
    %c0_i32_1 = arith.constant 0 : i32
    return %c0_i32, %c0_i32_0 : i32, i32
  }
  func.func @transform_5(%arg0: i32) -> (i32, i32) {
    %c0_i32 = arith.constant 0 : i32
    %c0_i32_0 = arith.constant 0 : i32
    %c0_i32_1 = arith.constant 0 : i32
    return %c0_i32, %c0_i32_0 : i32, i32
  }
  func.func @transform_6(%arg0: i32) -> (i32, i32) {
    %c0_i32 = arith.constant 0 : i32
    %c0_i32_0 = arith.constant 0 : i32
    %c0_i32_1 = arith.constant 0 : i32
    return %c0_i32, %c0_i32_0 : i32, i32
  }
  func.func @transform_7(%arg0: i32) -> (i32, i32) {
    %c0_i32 = arith.constant 0 : i32
    %c0_i32_0 = arith.constant 0 : i32
    %c0_i32_1 = arith.constant 0 : i32
    return %c0_i32, %c0_i32_0 : i32, i32
  }
  func.func @transform_8(%arg0: i32) -> (i32, i32) {
    %c0_i32 = arith.constant 0 : i32
    %c0_i32_0 = arith.constant 0 : i32
    %c0_i32_1 = arith.constant 0 : i32
    return %c0_i32, %c0_i32_0 : i32, i32
  }
  func.func @transform_9(%arg0: i32) -> (i32, i32) {
    %c0_i32 = arith.constant 0 : i32
    %c0_i32_0 = arith.constant 0 : i32
    %c0_i32_1 = arith.constant 0 : i32
    return %c0_i32, %c0_i32_0 : i32, i32
  }
  func.func @transform_10(%arg0: i32) -> (i32, i32) {
    %c0_i32 = arith.constant 0 : i32
    %c0_i32_0 = arith.constant 0 : i32
    %c0_i32_1 = arith.constant 0 : i32
    return %c0_i32, %c0_i32_0 : i32, i32
  }
  func.func @transform_11(%arg0: i32) -> (i32, i32) {
    %c0_i32 = arith.constant 0 : i32
    %c0_i32_0 = arith.constant 0 : i32
    %c0_i32_1 = arith.constant 0 : i32
    return %c0_i32, %c0_i32_0 : i32, i32
  }
  func.func @transform_12(%arg0: i32) -> (i32, i32) {
    %c0_i32 = arith.constant 0 : i32
    %c0_i32_0 = arith.constant 0 : i32
    %c0_i32_1 = arith.constant 0 : i32
    return %c0_i32, %c0_i32_0 : i32, i32
  }
  func.func @transform_13(%arg0: i32) -> (i32, i32, i32) {
    %c0_i32 = arith.constant 0 : i32
    %c0_i32_0 = arith.constant 0 : i32
    %c0_i32_1 = arith.constant 0 : i32
    return %arg0, %c0_i32, %c0_i32_0 : i32, i32, i32
  }
}

</mosaic_0001>

<bundles_post_ra>
// kernel: mul.9
= control target key start
LH: loop header
LB: loop body
LE: loop exit
PB: predicated region body
PF: predicated region fallthrough
CT: control target
= control target key end

     0   :  { %3 = vsyncpa [#allocation1], 0  ;;  %s70_s9 = smov [#allocation0]   ;;  %s116_s0 = inlined_call_operand.hbm [shape: f32[1,384], index: 0, kind: input, shape index: {}]   ;;  %s117_s1 = inlined_call_operand.vmem [shape: f32[1,384], index: 1, kind: input, shape index: {}]   ;;  %s118_s2 = inlined_call_operand.vmem [shape: f32[1,384], index: 2, kind: output, shape index: {}]  }
   0x1   :  { %s8_s10 = sshll.u32 %s70_s9, 4  ;;  %s46_s13 = scalar_lea.hbm %s116_s0, 48  ;;  %s9_s10 = int_to_ptr.vmem [resolvable:$true] %s8_s10 }
   0x2   :  { %p47_p0 = scmp.ne.s32.totalorder %s116_s0, %s46_s13  ;;  %p50_p1 = scmp.lt.u32.totalorder %s46_s13, %s116_s0 }
   0x4   :  { %p52_p2 = pnand %p50_p1, %p47_p0 }
   0x6   :  { %55 = shalt.err (!%p52_p2)
}
   0x7   :  { %s56_s18 = scalar_lea.vmem %s9_s10, 48  ;;  %s60_s19 = scalar_lea.vmem %s9_s10, 64 }
   0x8   :  { %p57_p3 = scmp.ne.s32.totalorder %s9_s10, %s56_s18  ;;  %p61_p4 = scmp.lt.s32.totalorder %s9_s10, %s9_s10 }
   0x9   :  { %p62_p5 = scmp.lt.s32.totalorder %s60_s19, %s56_s18 }
   0xb   :  { %p63_p6 = por %p62_p5, %p61_p4 }
   0xd   :  { %p64_p7 = pnand %p63_p6, %p57_p3 }
   0xf   :  { %67 = shalt.err (!%p64_p7)
}
  0x10   :  { %11 = dma.hbm_to_vmem [thread:$0]  %s116_s0, 48, %s9_s10, [#allocation1]  }
  0x11   :  { %68 = dma.done.wait [#allocation1], 48  }
  0x12   :  { %69 = vsyncadd [#allocation1], 4294967248  ;;  %v13_v0 = vld [vmem:[#allocation0] sm:$0x1]  ;;  %v21_v2 = vld [vmem:[#allocation0 + $0x1] sm:$0x1] }
  0x13   :  { %v14_v1 = vld [vmem:[%s117_s1] sm:$0x1]  ;;  %v41_v4 = vld [vmem:[%s117_s1 + $0x1] sm:$0x1]  ;;  %v31_v5 = vld [vmem:[#allocation0 + $0x2] sm:$0x1] }
  0x14   :  { %v17_v3 = vmul.f32 %v14_v1, %v13_v0  ;;  %v43_v6 = vld [vmem:[%s117_s1 + $0x2] sm:$0x1]  ;;  %v26_v7 = vmul.f32 %v41_v4, %v21_v2 }
  0x15   :  { %v36_v8 = vmul.f32 %v43_v6, %v31_v5 }
  0x16   :  { %19 = vst [vmem:[%s118_s2] sm:$0x1] %v17_v3  ;;  %42 = vst [vmem:[%s118_s2 + $0x1] sm:$0x1] %v26_v7 }
  0x17   :  { %44 = vst [vmem:[%s118_s2 + $0x2] sm:$0x1] %v36_v8 }
  0x18   :  { %40 = vsyncpa [#allocation1], 1 }

// kernel: transformer_block.1
= control target key start
LH: loop header
LB: loop body
LE: loop exit
PB: predicated region body
PF: predicated region fallthrough
CT: control target
= control target key end

     0   :  { %s4593_s0 = inlined_call_operand.vmem [shape: f32[2,32,128], index: 0, kind: input, shape index: {}]   ;;  %s4594_s1 = inlined_call_operand.vmem [shape: f32[1,128], index: 1, kind: input, shape index: {}]   ;;  %s4595_s2 = inlined_call_operand.vmem [shape: f32[1,128], index: 2, kind: input, shape index: {}]   ;;  %s4596_s3 = inlined_call_operand.vmem [shape: bf16[128,384], index: 3, kind: input, shape index: {}]   ;;  %s4597_s4 = inlined_call_operand.vmem [shape: f32[1,384], index: 4, kind: input, shape index: {}]   ;;  %s4598_s5 = inlined_call_operand.vmem [shape: bf16[128,128], index: 5, kind: input, shape index: {}]   ;;  %s4599_s6 = inlined_call_operand.vmem [shape: f32[1,128], index: 6, kind: input, shape index: {}]   ;;  %s4600_s7 = inlined_call_operand.vmem [shape: f32[1,128], index: 7, kind: input, shape index: {}]   ;;  %s4601_s8 = inlined_call_operand.vmem [shape: f32[1,128], index: 8, kind: input, shape index: {}]   ;;  %s4602_s9 = inlined_call_operand.vmem [shape: bf16[128,512], index: 9, kind: input, shape index: {}]   ;;  %s4603_s10 = inlined_call_operand.vmem [shape: f32[1,512], index: 10, kind: input, shape index: {}]   ;;  %s4604_s11 = inlined_call_operand.vmem [shape: bf16[512,128], index: 11, kind: input, shape index: {}]   ;;  %s4605_s12 = inlined_call_operand.vmem [shape: f32[1,128], index: 12, kind: input, shape index: {}]   ;;  %s4606_s13 = inlined_call_operand.hbm [shape: f32[2,32,128], index: 13, kind: output, shape index: {}]  }
   0x1   :  { %4610 = sst [smem:[#allocation7_spill]] %s4593_s0 }
   0x2   :  { %18 = vsyncpa [#allocation3], 0 }
   0x3   :  { %20 = vsyncpa [#allocation3 + $0x1], 0  ;;  %s3703_s25 = smov 0   ;;  %s3705_s26 = smov 0  }
   0x4   :  { %s3707_s27 = smov 0   ;;  %s3709_s28 = smov 0  }
   0x5 LB: > { %4611 = sst [smem:[#allocation5_spill]] %s3620_s27  ;;  %s3724_s29 = sadd.s32 4294967295, %s3624_s28   ;;  %s3624_s28 = sphi %s3709_s28, %s4621_s28   ;;  %s3620_s27 = sphi %s3707_s27, %s4618_s27   ;;  %s3616_s26 = sphi %s3705_s26, %s4620_s26   ;;  %s3612_s25 = sphi %s3703_s25, %s4619_s25  }
   0x6   : > { %s2809_s30 = sadd.s32 4294967294, %s3624_s28   ;;  %s3728_s14 = sadd.s32 1, %s3624_s28  }
   0x7   : > { %s311_s15 = sadd.s32 1, %s3620_s27  ;;  %s308_s16 = ssub.s32 %s3624_s28, %s3728_s14 }
   0x8   : > { %p321_p0 = scmp.ne.s32.totalorder %s3620_s27, %s3616_s26  ;;  %p309_p1 = scmp.eq.s32.totalorder %s308_s16, 0 }
   0x9   : > { %p322_p2 = scmp.eq.s32.totalorder %s3724_s29, 1  ;;  %p327_p3 = scmp.ne.s32.totalorder %s3616_s26, %s3612_s25 }
   0xa   : > { %p328_p4 = scmp.eq.s32.totalorder %s2809_s30, 1  ;;  %p2812_p7 = scmp.ge.s32.totalorder %s3624_s28, 1 }
   0xb   : > { %s3739_s17 = scalar_select %p309_p1, %s3620_s27, %s311_s15  }
   0xc   : > { %p3741_p5 = por %p322_p2, %p321_p0  ;;  %p3745_p6 = por %p328_p4, %p327_p3 }
   0xd   : > { %4612 = sst [smem:[#allocation6_spill]] %s3739_s17  ;;  %p390_p8 = scmp.lt.s32.totalorder %s3624_s28, 3 }
   0xf   : > { %p391_p9 = pnand %p2812_p7, %p390_p8 }
  0x10   : > { %p434_p10 = scmp.lt.s32.totalorder (!%p391_p9), %s3724_s29, 1  ;;  %v3326_v0 = vld [vmem:[%s4596_s3 + $0x4] ss:$12 sps:$4 sm:$0xff] (!%p391_p9)   ;;  %s4615_s0 = sld [smem:[#allocation7_spill]] (!%p391_p9)  ;;  %v3328_v9 = vld [vmem:[%s4596_s3] ss:$12 sps:$4 sm:$0xff] (!%p391_p9)  }
  0x11   : > { %394 = sbr.rel (%p391_p9) target bundleno = 2192 (0x890), region = 72  ;;  %698 = vmatprep.subr.bf16.mxu0 (!%p391_p9), %v3326_v0  ;;  %v3329_v10 = vld [vmem:[%s4596_s3 + $0x1c] ss:$12 sps:$4 sm:$0xff] (!%p391_p9)   ;;  %v3331_v11 = vld [vmem:[%s4596_s3 + $0x18] ss:$12 sps:$4 sm:$0xff] (!%p391_p9)   ;;  %v3626_v30 = vmov (!%p391_p9), 0  }
  0x12   : > { %699 = vmatpush1.bf16.msra.mxu0 (!%p391_p9), %v3328_v9  ;;  %v3332_v12 = vld [vmem:[%s4596_s3 + $0x34] ss:$12 sps:$4 sm:$0xff] (!%p391_p9)   ;;  %v3335_v14 = vld [vmem:[%s4596_s3 + $0x30] ss:$12 sps:$4 sm:$0xff] (!%p391_p9)   ;;  %v3336_v15 = vld [vmem:[%s4596_s3 + $0x4c] ss:$12 sps:$4 sm:$0xff] (!%p391_p9)   ;;  %730 = vmatprep.mubr.bf16.mxu0 (!%p391_p9), %v3626_v30 }
  0x13   : > { %700 = vmatprep.subr.bf16.mxu0 (!%p391_p9), %v3329_v10  ;;  %v3334_v13 = vld [vmem:[%s4596_s3 + $0x8] ss:$12 sps:$4 sm:$0xff] (!%p391_p9)   ;;  %v3338_v16 = vld [vmem:[%s4596_s3 + $0x20] ss:$12 sps:$4 sm:$0xff] (!%p391_p9)   ;;  %v3340_v18 = vld [vmem:[%s4596_s3 + $0x64] ss:$12 sps:$4 sm:$0xff] (!%p391_p9)  }
  0x14   : > { %3049 = vmatprep.subr.bf16.mxu1 (!%p391_p9), %v3334_v13  ;;  %v3339_v17 = vld [vmem:[%s4596_s3 + $0x48] ss:$12 sps:$4 sm:$0xff] (!%p391_p9)   ;;  %v3342_v19 = vld [vmem:[%s4596_s3 + $0x38] ss:$12 sps:$4 sm:$0xff] (!%p391_p9)   ;;  %v3343_v20 = vld [vmem:[%s4596_s3 + $0x60] ss:$12 sps:$4 sm:$0xff] (!%p391_p9)  }
  0x15   : > { %3050 = vmatpush3.bf16.msra.mxu1 (!%p391_p9), %v3334_v13  ;;  %v3344_v21 = vld [vmem:[%s4596_s3 + $0x7c] ss:$12 sps:$4 sm:$0xff] (!%p391_p9)   ;;  %v3347_v23 = vld [vmem:[%s4596_s3 + $0x78] ss:$12 sps:$4 sm:$0xff] (!%p391_p9)   ;;  %v3348_v24 = vld [vmem:[%s4596_s3 + $0x94] ss:$12 sps:$4 sm:$0xff] (!%p391_p9)  }
  0x16   : > { %701 = vmatpush1.bf16.msra.mxu0 (!%p391_p9), %v3331_v11  ;;  %3051 = vmatprep.subr.bf16.mxu1 (!%p391_p9), %v3338_v16  ;;  %v3346_v22 = vld [vmem:[%s4596_s3 + $0x50] ss:$12 sps:$4 sm:$0xff] (!%p391_p9)   ;;  %v3350_v25 = vld [vmem:[%s4596_s3 + $0x68] ss:$12 sps:$4 sm:$0xff] (!%p391_p9)   ;;  %v3352_v27 = vld [vmem:[%s4596_s3 + $0xac] ss:$12 sps:$4 sm:$0xff] (!%p391_p9)  }
  0x17   : > { %702 = vmatprep.subr.bf16.mxu0 (!%p391_p9), %v3332_v12  ;;  %v3351_v26 = vld [vmem:[%s4596_s3 + $0x90] ss:$12 sps:$4 sm:$0xff] (!%p391_p9)   ;;  %v3354_v28 = vld [vmem:[%s4596_s3 + $0x80] ss:$12 sps:$4 sm:$0xff] (!%p391_p9)   ;;  %v3355_v29 = vld [vmem:[%s4596_s3 + $0xa8] ss:$12 sps:$4 sm:$0xff] (!%p391_p9)  }
  0x18   : > { %s435_s22 = scalar_select %p434_p10, %s3724_s29, 1  ;;  %v3356_v31 = vld [vmem:[%s4596_s3 + $0x98] ss:$12 sps:$4 sm:$0xff]   ;;  %v3357_v32 = vld [vmem:[%s4596_s3 + $0xb0] ss:$12 sps:$4 sm:$0xff]   ;;  %vm936_vm0 = vcmask 261120  }
  0x19   : > { %3052 = vmatpush3.bf16.msra.mxu1 %v3338_v16  ;;  %v2816_v0 = vld [vmem:[%s4594_s1] ss:$0 sm:$0xff]  ;;  %s4608_s21 = smov 96   ;;  %vm1680_vm5 = vcmask 523264   ;;  %vm1685_vm6 = vcmask 785408   ;;  %s431_s17 = sand.u32 1, %s3616_s26  }
  0x1a   : > { %s2939_s23 = sshll.u32 %s435_s22, 5  ;;  %703 = vmatpush1.bf16.msra.mxu0 %v3335_v14  ;;  %3053 = vmatprep.subr.bf16.mxu1 %v3342_v19  ;;  %v2817_v9 = vld [vmem:[%s4595_s2] ss:$0 sm:$0xff]  ;;  %s3628_s22 = smov 32  }
  0x1b   : > { %s3759_s15 = scalar_lea.vmem %s4615_s0, %s2939_s23  ;;  %704 = vmatprep.subr.bf16.mxu0 %v3336_v15  ;;  %s3629_s23 = smov 64  }
  0x1c   : > { %v3762_v1 = vld [vmem:[%s3759_s15] sm:$0xff]  ;;  %v3765_v2 = vld [vmem:[%s3759_s15 + $0x8] sm:$0xff]  ;;  %v3773_v5 = vld [vmem:[%s3759_s15 + $0x10] sm:$0xff]  ;;  %s2813_s16 = sshll.u32 %s431_s17, 5  ;;  %s4552_s0 = scalar_lea.sflag [#allocation3], %s431_s17 }
  0x1d   : > { %446 = vadd.xlane.f32.xlu0 %v3762_v1  ;;  %v459_v3 = vmul.f32 %v3762_v1, %v3762_v1  ;;  %v460_v4 = vmul.f32 %v3765_v2, %v3765_v2  ;;  %v3777_v6 = vld [vmem:[%s3759_s15 + $0x18] sm:$0xff]  ;;  %v461_v7 = vmul.f32 %v3773_v5, %v3773_v5  ;;  %3054 = vmatpush3.bf16.msra.mxu1 %v3342_v19  ;;  %s3630_s30 = smov [#allocation2]  }
  0x1e   : > { %v462_v8 = vmul.f32 %v3777_v6, %v3777_v6  ;;  %705 = vmatpush1.bf16.msra.mxu0 %v3339_v17  ;;  %3055 = vmatprep.subr.bf16.mxu1 %v3346_v22  ;;  %s3566_s27 = sshll.u32 %s3630_s30, 4  ;;  %s3567_s27 = int_to_ptr.vmem [resolvable:$false] %s3566_s27 }
  0x1f   : > { %463 = vadd.xlane.f32.xlu1 %v459_v3  ;;  %706 = vmatprep.subr.bf16.mxu0 %v3340_v18 }
  0x21   : > { %448 = vadd.xlane.f32.xlu0 %v3765_v2  ;;  %3056 = vmatpush3.bf16.msra.mxu1 %v3346_v22 }
  0x22   : > { %707 = vmatpush1.bf16.msra.mxu0 %v3343_v20  ;;  %3057 = vmatprep.subr.bf16.mxu1 %v3350_v25 }
  0x23   : > { %465 = vadd.xlane.f32.xlu1 %v460_v4  ;;  %708 = vmatprep.subr.bf16.mxu0 %v3344_v21 }
  0x25   : > { %450 = vadd.xlane.f32.xlu0 %v3773_v5  ;;  %3058 = vmatpush3.bf16.msra.mxu1 %v3350_v25 }
  0x26   : > { %709 = vmatpush1.bf16.msra.mxu0 %v3347_v23  ;;  %3059 = vmatprep.subr.bf16.mxu1 %v3354_v28 }
  0x27   : > { %452 = vadd.xlane.f32.xlu1 %v3777_v6  ;;  %710 = vmatprep.subr.bf16.mxu0 %v3348_v24  ;;  %v553_v24 = vld [vmem:[%s4597_s4] sm:$0x7] }
  0x29   : > { %467 = vadd.xlane.f32.xlu0 %v461_v7  ;;  %3060 = vmatpush3.bf16.msra.mxu1 %v3354_v28 }
  0x2a   : > { %711 = vmatpush1.bf16.msra.mxu0 %v3351_v26  ;;  %3061 = vmatprep.subr.bf16.mxu1 %v3356_v31 }
  0x2b   : > { %469 = vadd.xlane.f32.xlu1 %v462_v8  ;;  %712 = vmatprep.subr.bf16.mxu0 %v3352_v27 }
  0x2d   : > { %3062 = vmatpush3.bf16.msra.mxu1 %v3356_v31 }
  0x2e   : > { %713 = vmatpush1.bf16.msra.mxu0 %v3355_v29  ;;  %3063 = vmatprep.subr.bf16.mxu1 %v3357_v32 }
  0x31   : > { %3064 = vmatpush3.bf16.msra.mxu1 %v3357_v32 }
  0xaa   : > { %v447_v33 = vpop.xlane.xlu0 %446 }
  0xab   : > { %v455_v34 = vmul.f32 0.0078125, %v447_v33 }
  0xac   : > { %v464_v35 = vpop.xlane.xlu1 %463 }
  0xad   : > { %v475_v36 = vmul.f32 %v455_v34, %v455_v34  ;;  %v471_v37 = vmul.f32 0.0078125, %v464_v35  ;;  %v483_v60 = vsub.f32 %v3762_v1, %v455_v34 }
  0xae   : > { %v449_v38 = vpop.xlane.xlu0 %448 }
  0xaf   : > { %v479_v39 = vsub.f32 %v471_v37, %v475_v36  ;;  %v456_v40 = vmul.f32 0.0078125, %v449_v38 }
  0xb0   : > { %v466_v41 = vpop.xlane.xlu1 %465 }
  0xb1   : > { %v487_v42 = vadd.f32 1e-05, %v479_v39  ;;  %v476_v43 = vmul.f32 %v456_v40, %v456_v40  ;;  %v472_v44 = vmul.f32 0.0078125, %v466_v41  ;;  %v484_v3 = vsub.f32 %v3765_v2, %v456_v40 }
  0xb2   : > { %v451_v45 = vpop.xlane.xlu0 %450 }
  0xb3   : > { %3446 = vrsqrt.f32 %v487_v42  ;;  %v480_v46 = vsub.f32 %v472_v44, %v476_v43  ;;  %v457_v47 = vmul.f32 0.0078125, %v451_v45 }
  0xb4   : > { %v453_v48 = vpop.xlane.xlu1 %452 }
  0xb5   : > { %v488_v49 = vadd.f32 1e-05, %v480_v46  ;;  %v477_v50 = vmul.f32 %v457_v47, %v457_v47  ;;  %v458_v51 = vmul.f32 0.0078125, %v453_v48  ;;  %v485_v1 = vsub.f32 %v3773_v5, %v457_v47 }
  0xb6   : > { %v468_v52 = vpop.xlane.xlu0 %467  ;;  %v555_v5 = vlaneseq }
  0xb7   : > { %3448 = vrsqrt.f32 %v488_v49  ;;  %v473_v53 = vmul.f32 0.0078125, %v468_v52  ;;  %v478_v55 = vmul.f32 %v458_v51, %v458_v51  ;;  %v486_v14 = vsub.f32 %v3777_v6, %v458_v51 }
  0xb8   : > { %v470_v54 = vpop.xlane.xlu1 %469  ;;  %v3867_v23 = vshrl.u32 %v555_v5, 7 }
  0xb9   : > { %v481_v56 = vsub.f32 %v473_v53, %v477_v50  ;;  %v474_v57 = vmul.f32 0.0078125, %v470_v54 }
  0xba   : > { %v557_v6 = vsub.s32 0, %v3867_v23  ;;  %v561_v25 = vsub.s32 1, %v3867_v23  ;;  %v565_v35 = vsub.s32 2, %v3867_v23 }
  0xbb   : > { %v489_v58 = vadd.f32 1e-05, %v481_v56  ;;  %v482_v59 = vsub.f32 %v474_v57, %v478_v55 }
  0xbc   : > { %v558_v26 = vrot.slane %v553_v24, %v557_v6  ;;  %v562_v28 = vrot.slane %v553_v24, %v561_v25  ;;  %v566_v42 = vrot.slane %v553_v24, %v565_v35 }
  0xbd   : > { %v3447_v61 = vpop.eup %3446  ;;  %3450 = vrsqrt.f32 %v489_v58  ;;  %v490_v62 = vadd.f32 1e-05, %v482_v59 }
  0xbe   : > { %v495_v63 = vmul.f32 %v3447_v61, %v483_v60 }
  0xbf   : > { %3452 = vrsqrt.f32 %v490_v62 }
  0xc0   : > { %v505_v8 = vmul.f32 %v2816_v0, %v495_v63 }
  0xc1   : > { %v3449_v4 = vpop.eup %3448 }
  0xc2   : > { %v496_v7 = vmul.f32 %v3449_v4, %v484_v3  ;;  %v515_v11 = vadd.f32 %v2817_v9, %v505_v8 }
  0xc4   : > { %v506_v10 = vmul.f32 %v2816_v0, %v496_v7 }
  0xc6   : > { %v516_v12 = vadd.f32 %v2817_v9, %v506_v10 }
  0xc7   : > { %v3451_v13 = vpop.eup %3450 }
  0xc8   : > { %v519_v15 = vpack.c.bf16 %v516_v12, %v515_v11  ;;  %v497_v16 = vmul.f32 %v3451_v13, %v485_v1 }
  0xc9   : > { %v3453_v17 = vpop.eup %3452 }
  0xca   : > { %731 = vmatmul.mubr.bf16.vlgmr.msra.gmra.mrb[0].mxu0 %v519_v15  ;;  %3065 = vmatprep.mubr.bf16.mxu1 %v519_v15  ;;  %v498_v2 = vmul.f32 %v3453_v17, %v486_v14  ;;  %v507_v18 = vmul.f32 %v2816_v0, %v497_v16 }
  0xcb   : > { %740 = vmatprep.mubr.bf16.mxu0 %v3626_v30 }
  0xcc   : > { %v508_v19 = vmul.f32 %v2816_v0, %v498_v2  ;;  %v517_v20 = vadd.f32 %v2817_v9, %v507_v18 }
  0xce   : > { %v518_v21 = vadd.f32 %v2817_v9, %v508_v19 }
  0xd0   : > { %v520_v22 = vpack.c.bf16 %v518_v21, %v517_v20 }
  0xd2   : > { %741 = vmatmul.mubr.bf16.gmra.mrb[4].mxu0 %v520_v22  ;;  %3066 = vmatmul.mubr.bf16.vlgmr.msra.gmra.mrb[0].mxu1 %v520_v22 }
 0x19d   : > { %v732_v27 = vpop.f32.mrb[0].mxu0 }
 0x19e   : > { %v734_v29 = vpop.f32.mrb[1].mxu0  ;;  %v733_v32 = vadd.f32 %v732_v27, %v558_v26 }
 0x19f   : > { %v736_v31 = vpop.f32.mrb[2].mxu0  ;;  %v735_v36 = vadd.f32 %v734_v29, %v562_v28 }
 0x1a0   : > { %v737_v33 = vadd.f32 %v736_v31, %v558_v26  ;;  %v738_v34 = vpop.f32.mrb[3].mxu0 }
 0x1a1   : > { %v739_v37 = vadd.f32 %v738_v34, %v562_v28 }
 0x1a2   : > { %v920_v38 = vpack.c.bf16 %v737_v33, %v733_v32  ;;  %v3241_v39 = vpack.i.bf16 %v737_v33, %v733_v32 }
 0x1a3   : > { %v3206_v40 = vpack.i.bf16 %v739_v37, %v735_v36  ;;  %v928_v41 = vpack.c.bf16 %v739_v37, %v735_v36 }
 0x1a4   : > { %3073 = vmatprep.mubr.msk.bf16.mxu1 %vm936_vm0, %v920_v38 }
 0x1a5   : > { %3207 = vrot.lane.b32.xlu0 %v3206_v40, %s4608_s21  ;;  %v742_v43 = vpop.f32.mrb[4].mxu0  ;;  %v3067_v44 = vpop.f32.mrb[0].mxu1  ;;  %3153 = vmatprep.subr.msk.bf16.mxu1 %vm936_vm0, %v928_v41  ;;  %v944_v45 = vsel %vm936_vm0, %v928_v41, 0 }
 0x1a6   : > { %v744_v46 = vpop.f32.mrb[5].mxu0  ;;  %v785_v47 = vpop.f32.mrb[1].mxu1  ;;  %3070 = vmatpush3.bf16.xpose.msra.mxu1 %v944_v45  ;;  %v743_v50 = vadd.f32 %v742_v43, %v558_v26  ;;  %v794_v51 = vadd.f32 %v3067_v44, %v566_v42 }
 0x1a7   : > { %v746_v48 = vpop.f32.mrb[6].mxu0  ;;  %v3068_v49 = vpop.f32.mrb[2].mxu1  ;;  %v745_v56 = vadd.f32 %v744_v46, %v562_v28  ;;  %v786_v57 = vadd.f32 %v785_v47, %v566_v42 }
 0x1a8   : > { %v747_v52 = vadd.f32 %v746_v48, %v558_v26  ;;  %v797_v53 = vadd.f32 %v3068_v49, %v566_v42  ;;  %v748_v54 = vpop.f32.mrb[7].mxu0  ;;  %v788_v55 = vpop.f32.mrb[3].mxu1 }
 0x1a9   : > { %v749_v58 = vadd.f32 %v748_v54, %v562_v28  ;;  %v789_v59 = vadd.f32 %v788_v55, %v566_v42  ;;  %3227 = vrot.lane.b32.xlu0 %v3206_v40, %s3628_s22 }
 0x1aa   : > { %v921_v60 = vpack.c.bf16 %v747_v52, %v743_v50  ;;  %v3231_v61 = vpack.i.bf16 %v747_v52, %v743_v50  ;;  %v3886_v3 = vpack.i.bf16 %v797_v53, %v794_v51  ;;  %v3893_v8 = vpack.c.bf16 %v797_v53, %v794_v51 }
 0x1ab   : > { %v3236_v62 = vpack.i.bf16 %v749_v58, %v745_v56  ;;  %v929_v63 = vpack.c.bf16 %v749_v58, %v745_v56  ;;  %v3266_v0 = vpack.i.bf16 %v789_v59, %v786_v57  ;;  %v3891_v7 = vpack.c.bf16 %v789_v59, %v786_v57 }
 0x1ad   : > { %3237 = vrot.lane.b32.xlu0 %v3236_v62, %s3629_s23  ;;  %3212 = vrot.lane.b32.xlu1 %v3236_v62, %s4608_s21  ;;  %v947_v4 = vsel %vm936_vm0, %v929_v63, 0 }
 0x1ae   : > { %3154 = vmatprep.subr.msk.bf16.mxu1 %vm936_vm0, %v929_v63 }
 0x1af   : > { %3072 = vmatpush3.bf16.xpose.msra.mxu1 %v947_v4 }
 0x1b1   : > { %3242 = vrot.lane.b32.xlu0 %v3241_v39, %s3629_s23  ;;  %3217 = vrot.lane.b32.xlu1 %v3206_v40, %s3629_s23 }
 0x1b5   : > { %3257 = vrot.lane.b32.xlu0 %v3241_v39, %s3628_s22  ;;  %3222 = vrot.lane.b32.xlu1 %v3241_v39, %s4608_s21 }
 0x1b6   : > { %3074 = vmatmul.mubr.msk.bf16.vlgmr.msra.gmra.mrb[4].mxu1 %vm936_vm0, %v921_v60 }
 0x1b9   : > { %3267 = vrot.lane.b32.xlu0 %v3266_v0, %s4608_s21  ;;  %3232 = vrot.lane.b32.xlu1 %v3231_v61, %s4608_s21 }
 0x1bd   : > { %3247 = vrot.lane.b32.xlu1 %v3236_v62, %s3628_s22 }
 0x1c1   : > { %3252 = vrot.lane.b32.xlu1 %v3231_v61, %s3629_s23 }
 0x1c5   : > { %3262 = vrot.lane.b32.xlu1 %v3231_v61, %s3628_s22 }
 0x1c9   : > { %3272 = vrot.lane.b32.xlu1 %v3886_v3, %s4608_s21 }
 0x1cd   : > { %3277 = vrot.lane.b32.xlu1 %v3266_v0, %s3629_s23 }
 0x1d1   : > { %3282 = vrot.lane.b32.xlu1 %v3266_v0, %s3628_s22 }
 0x217   : > { %v3208_v9 = vpop.permute.xlu0 %3207 }
 0x218   : > { %v3210_v10 = vunpack.i.h.bf16 %v3208_v9  ;;  %v3209_v1 = vunpack.i.l.bf16 %v3208_v9 }
 0x21a   : > { %v930_v11 = vpack.c.bf16 %v3210_v10, %v3209_v1 }
 0x21b   : > { %v3228_v12 = vpop.permute.xlu0 %3227 }
 0x21c   : > { %3155 = vmatprep.subr.msk.bf16.mxu1 %vm936_vm0, %v930_v11  ;;  %v1005_v13 = vsel %vm936_vm0, %v930_v11, 0  ;;  %v3230_v2 = vunpack.i.h.bf16 %v3228_v12  ;;  %v3229_v18 = vunpack.i.l.bf16 %v3228_v12 }
 0x21d   : > { %3078 = vmatpush3.bf16.xpose.msra.mxu1 %v1005_v13 }
 0x21e   : > { %v934_v28 = vpack.c.bf16 %v3230_v2, %v3229_v18 }
 0x21f   : > { %v3238_v14 = vpop.permute.xlu0 %3237  ;;  %v3213_v15 = vpop.permute.xlu1 %3212 }
 0x220   : > { %v3215_v16 = vunpack.i.h.bf16 %v3213_v15  ;;  %v3214_v17 = vunpack.i.l.bf16 %v3213_v15  ;;  %v3240_v29 = vunpack.i.h.bf16 %v3238_v14  ;;  %v3239_v31 = vunpack.i.l.bf16 %v3238_v14 }
 0x221   : > { %v1127_v53 = vsel %vm936_vm0, %v934_v28, 0 }
 0x222   : > { %v931_v19 = vpack.c.bf16 %v3215_v16, %v3214_v17  ;;  %v933_v40 = vpack.c.bf16 %v3240_v29, %v3239_v31 }
 0x223   : > { %v3243_v20 = vpop.permute.xlu0 %3242  ;;  %v3218_v21 = vpop.permute.xlu1 %3217 }
 0x224   : > { %v3245_v22 = vunpack.i.h.bf16 %v3243_v20  ;;  %v3244_v24 = vunpack.i.l.bf16 %v3243_v20  ;;  %v3220_v26 = vunpack.i.h.bf16 %v3218_v21  ;;  %v3219_v27 = vunpack.i.l.bf16 %v3218_v21  ;;  %3156 = vmatprep.subr.msk.bf16.mxu1 %vm936_vm0, %v931_v19 }
 0x225   : > { %v1008_v32 = vsel %vm936_vm0, %v931_v19, 0  ;;  %v1069_v55 = vsel %vm936_vm0, %v933_v40, 0  ;;  %v3940_v21 = vand.u32 127, %v555_v5 }
 0x226   : > { %v924_v33 = vpack.c.bf16 %v3245_v22, %v3244_v24  ;;  %v932_v34 = vpack.c.bf16 %v3220_v26, %v3219_v27  ;;  %3080 = vmatpush3.bf16.xpose.msra.mxu1 %v1008_v32  ;;  %v3943_v22 = vadd.s32 8, %v3867_v23  ;;  %v1185_v26 = vadd.s32 24, %v3867_v23 }
 0x227   : > { %3159 = vmatprep.subr.msk.bf16.mxu1 %vm936_vm0, %v934_v28  ;;  %v3223_v36 = vpop.permute.xlu1 %3222  ;;  %v3258_v37 = vpop.permute.xlu0 %3257  ;;  %vm1188_vm2 = vcmp.ge.s32.totalorder %v3867_v23, %v3940_v21 }
 0x228   : > { %v3225_v38 = vunpack.i.h.bf16 %v3223_v36  ;;  %v3224_v39 = vunpack.i.l.bf16 %v3223_v36  ;;  %3157 = vmatprep.subr.msk.bf16.mxu0 %vm936_vm0, %v932_v34  ;;  %3089 = vmatprep.mubr.msk.bf16.mxu0 %vm936_vm0, %v924_v33  ;;  %v1066_v41 = vsel %vm936_vm0, %v932_v34, 0  ;;  %v3260_v43 = vunpack.i.h.bf16 %v3258_v37 }
 0x229   : > { %3086 = vmatpush3.bf16.xpose.msra.mxu0 %v1066_v41  ;;  %v3259_v44 = vunpack.i.l.bf16 %v3258_v37  ;;  %vm1189_vm3 = vcmp.ge.s32.totalorder %v3943_v22, %v3940_v21  ;;  %vm1191_vm4 = vcmp.ge.s32.totalorder %v1185_v26, %v3940_v21 }
 0x22a   : > { %v922_v42 = vpack.c.bf16 %v3225_v38, %v3224_v39  ;;  %3158 = vmatprep.subr.msk.bf16.mxu0 %vm936_vm0, %v933_v40 }
 0x22b   : > { %v3233_v45 = vpop.permute.xlu1 %3232  ;;  %v926_v49 = vpack.c.bf16 %v3260_v43, %v3259_v44  ;;  %v3268_v54 = vpop.permute.xlu0 %3267 }
 0x22c   : > { %v3235_v46 = vunpack.i.h.bf16 %v3233_v45  ;;  %v3234_v47 = vunpack.i.l.bf16 %v3233_v45  ;;  %3081 = vmatprep.mubr.msk.bf16.mxu1 %vm936_vm0, %v922_v42  ;;  %v3270_v58 = vunpack.i.h.bf16 %v3268_v54  ;;  %v3269_v59 = vunpack.i.l.bf16 %v3268_v54 }
 0x22e   : > { %v923_v48 = vpack.c.bf16 %v3235_v46, %v3234_v47  ;;  %v1370_v0 = vpack.c.bf16 %v3270_v58, %v3269_v59 }
 0x22f   : > { %v3248_v50 = vpop.permute.xlu1 %3247 }
 0x230   : > { %v3250_v51 = vunpack.i.h.bf16 %v3248_v50  ;;  %v3249_v52 = vunpack.i.l.bf16 %v3248_v50  ;;  %3082 = vmatmul.mubr.msk.bf16.vlgmr.msra.gmra.mrb[8].mxu1 %vm936_vm0, %v923_v48 }
 0x231   : > { %3094 = vmatpush3.bf16.xpose.msra.mxu1 %v1127_v53  ;;  %3097 = vmatprep.mubr.msk.bf16.mxu1 %vm936_vm0, %v926_v49 }
 0x232   : > { %v935_v56 = vpack.c.bf16 %v3250_v51, %v3249_v52  ;;  %3088 = vmatpush3.bf16.xpose.msra.mxu0 %v1069_v55 }
 0x233   : > { %3101 = vmatprep.subr.bf16.mxu0 %v3891_v7  ;;  %v3253_v57 = vpop.permute.xlu1 %3252 }
 0x234   : > { %v3255_v60 = vunpack.i.h.bf16 %v3253_v57  ;;  %v3254_v61 = vunpack.i.l.bf16 %v3253_v57  ;;  %3160 = vmatprep.subr.msk.bf16.mxu1 %vm936_vm0, %v935_v56  ;;  %v1130_v4 = vsel %vm936_vm0, %v935_v56, 0 }
 0x236   : > { %v925_v62 = vpack.c.bf16 %v3255_v60, %v3254_v61 }
 0x237   : > { %v3263_v63 = vpop.permute.xlu1 %3262 }
 0x238   : > { %v3265_v9 = vunpack.i.h.bf16 %v3263_v63  ;;  %v3264_v10 = vunpack.i.l.bf16 %v3263_v63 }
 0x239   : > { %3090 = vmatmul.mubr.msk.bf16.vlgmr.msra.gmra.mrb[8].mxu0 %vm936_vm0, %v925_v62  ;;  %3096 = vmatpush3.bf16.xpose.msra.mxu1 %v1130_v4 }
 0x23a   : > { %3102 = vmatpush3.bf16.msra.mxu0 %v3891_v7  ;;  %3109 = vmatprep.subr.bf16.mxu1 %v1370_v0  ;;  %v927_v13 = vpack.c.bf16 %v3265_v9, %v3264_v10 }
 0x23b   : > { %3103 = vmatprep.subr.bf16.mxu0 %v3893_v8  ;;  %v3273_v1 = vpop.permute.xlu1 %3272 }
 0x23c   : > { %v3275_v11 = vunpack.i.h.bf16 %v3273_v1  ;;  %v3274_v12 = vunpack.i.l.bf16 %v3273_v1 }
 0x23e   : > { %v1371_v14 = vpack.c.bf16 %v3275_v11, %v3274_v12  ;;  %3104 = vmatpush3.bf16.msra.mxu0 %v3893_v8  ;;  %v1184_v8 = vadd.s32 16, %v3867_v23 }
 0x23f   : > { %v3278_v15 = vpop.permute.xlu1 %3277 }
 0x240   : > { %v3280_v16 = vunpack.i.h.bf16 %v3278_v15  ;;  %v3279_v17 = vunpack.i.l.bf16 %v3278_v15  ;;  %3098 = vmatmul.mubr.msk.bf16.vlgmr.msra.gmra.mrb[12].mxu1 %vm936_vm0, %v927_v13  ;;  %vm1190_vm1 = vcmp.ge.s32.totalorder %v1184_v8, %v3940_v21 }
 0x241   : > { %3110 = vmatpush3.bf16.msra.mxu1 %v1370_v0 }
 0x242   : > { %v3932_v2 = vpack.c.bf16 %v3280_v16, %v3279_v17  ;;  %3111 = vmatprep.subr.bf16.mxu1 %v1371_v14 }
 0x243   : > { %v3283_v7 = vpop.permute.xlu1 %3282 }
 0x244   : > { %v3285_v18 = vunpack.i.h.bf16 %v3283_v7  ;;  %v3284_v19 = vunpack.i.l.bf16 %v3283_v7  ;;  %3117 = vmatprep.subr.bf16.mxu0 %v3932_v2 }
 0x245   : > { %3112 = vmatpush3.bf16.msra.mxu1 %v1371_v14 }
 0x246   : > { %v3935_v20 = vpack.c.bf16 %v3285_v18, %v3284_v19 }
 0x248   : > { %3125 = vmatprep.subr.bf16.mxu1 %v3935_v20 }
 0x289   : > { %v3075_v24 = vpop.f32.mrb[4].mxu1 }
 0x28a   : > { %v3951_v27 = vsel %vm1190_vm1, %v3075_v24, -1e+30  ;;  %v983_v28 = vpop.f32.mrb[5].mxu1 }
 0x28b   : > { %v3076_v5 = vpop.f32.mrb[6].mxu1  ;;  %v1222_v29 = vsel %vm936_vm0, %v3951_v27, -inf  ;;  %v3960_v31 = vsel %vm1188_vm2, %v983_v28, -1e+30 }
 0x28c   : > { %1223 = vmax.xlane.f32.xlu0 %v1222_v29  ;;  %v986_v32 = vpop.f32.mrb[7].mxu1  ;;  %v1216_v36 = vsel %vm936_vm0, %v3960_v31, -inf  ;;  %v3971_v37 = vsel %vm1191_vm4, %v3076_v5, -1e+30 }
 0x28d   : > { %v1201_v33 = vsel %vm1189_vm3, %v986_v32, -1e+30  ;;  %v1225_v38 = vsel %vm936_vm0, %v3971_v37, -inf }
 0x28e   : > { %v1219_v34 = vsel %vm936_vm0, %v1201_v33, -inf }
 0x28f   : > { %1220 = vmax.xlane.f32.xlu1 %v1219_v34 }
 0x290   : > { %1217 = vmax.xlane.f32.xlu0 %v1216_v36 }
 0x294   : > { %1226 = vmax.xlane.f32.xlu0 %v1225_v38 }
 0x303   : > { %v3083_v39 = vpop.f32.mrb[8].mxu1 }
 0x304   : > { %v3977_v40 = vsel %vm1190_vm1, %v3083_v39, -1e+30  ;;  %v1044_v41 = vpop.f32.mrb[9].mxu1 }
 0x305   : > { %v3084_v42 = vpop.f32.mrb[10].mxu1  ;;  %v1234_v43 = vsel %vm936_vm0, %v3977_v40, -inf  ;;  %v3996_v52 = vsel %vm1188_vm2, %v1044_v41, -1e+30 }
 0x306   : > { %v3983_v44 = vsel %vm1191_vm4, %v3084_v42, -1e+30  ;;  %1235 = vmax.xlane.f32.xlu0 %v1234_v43  ;;  %v1047_v45 = vpop.f32.mrb[11].mxu1  ;;  %v1228_v57 = vsel %vm936_vm0, %v3996_v52, -inf }
 0x307   : > { %v1237_v46 = vsel %vm936_vm0, %v3983_v44, -inf  ;;  %v4007_v56 = vsel %vm1189_vm3, %v1047_v45, -1e+30 }
 0x308   : > { %1238 = vmax.xlane.f32.xlu1 %v1237_v46  ;;  %v1231_v61 = vsel %vm936_vm0, %v4007_v56, -inf }
 0x30c   : > { %v3091_v47 = vpop.f32.mrb[8].mxu0 }
 0x30d   : > { %v3989_v48 = vsel %vm1190_vm1, %v3091_v47, -1e+30  ;;  %v1105_v49 = vpop.f32.mrb[9].mxu0 }
 0x30e   : > { %v3092_v50 = vpop.f32.mrb[10].mxu0  ;;  %v1246_v51 = vsel %vm936_vm0, %v3989_v48, -inf  ;;  %v4014_v58 = vsel %vm1188_vm2, %v1105_v49, -1e+30 }
 0x30f   : > { %v4000_v53 = vsel %vm1191_vm4, %v3092_v50, -1e+30  ;;  %v1108_v54 = vpop.f32.mrb[11].mxu0  ;;  %1247 = vmax.xlane.f32.xlu0 %v1246_v51  ;;  %v1240_v4 = vsel %vm936_vm0, %v4014_v58, -inf }
 0x310   : > { %v1249_v55 = vsel %vm936_vm0, %v4000_v53, -inf  ;;  %v4021_v62 = vsel %vm1189_vm3, %v1108_v54, -1e+30 }
 0x311   : > { %1250 = vmax.xlane.f32.xlu1 %v1249_v55  ;;  %v1243_v10 = vsel %vm936_vm0, %v4021_v62, -inf }
 0x313   : > { %1229 = vmax.xlane.f32.xlu0 %v1228_v57  ;;  %v3099_v59 = vpop.f32.mrb[12].mxu1 }
 0x314   : > { %v1166_v60 = vpop.f32.mrb[13].mxu1  ;;  %v4027_v9 = vsel %vm1190_vm1, %v3099_v59, -1e+30 }
 0x315   : > { %1232 = vmax.xlane.f32.xlu1 %v1231_v61  ;;  %v3100_v63 = vpop.f32.mrb[14].mxu1  ;;  %v1258_v12 = vsel %vm936_vm0, %v4027_v9, -inf  ;;  %v4040_v13 = vsel %vm1188_vm2, %v1166_v60, -1e+30 }
 0x316   : > { %v1169_v0 = vpop.f32.mrb[15].mxu1  ;;  %v4033_v1 = vsel %vm1191_vm4, %v3100_v63, -1e+30  ;;  %v1252_v8 = vsel %vm936_vm0, %v4040_v13, -inf }
 0x317   : > { %1241 = vmax.xlane.f32.xlu0 %v1240_v4  ;;  %v1261_v15 = vsel %vm936_vm0, %v4033_v1, -inf  ;;  %v4047_v16 = vsel %vm1189_vm3, %v1169_v0, -1e+30 }
 0x318   : > { %v1255_v28 = vsel %vm936_vm0, %v4047_v16, -inf }
 0x319   : > { %v1224_v11 = vpop.xlane.xlu0 %1223  ;;  %1244 = vmax.xlane.f32.xlu1 %v1243_v10 }
 0x31a   : > { %v1266_v17 = vsub.f32 %v3951_v27, %v1224_v11 }
 0x31b   : > { %1259 = vmax.xlane.f32.xlu0 %v1258_v12 }
 0x31c   : > { %v1221_v14 = vpop.xlane.xlu1 %1220  ;;  %v1284_v5 = vmul.f32 1.442695, %v1266_v17 }
 0x31d   : > { %v1265_v7 = vsub.f32 %v1201_v33, %v1221_v14  ;;  %v1218_v18 = vpop.xlane.xlu0 %1217  ;;  %1262 = vmax.xlane.f32.xlu1 %v1261_v15 }
 0x31e   : > { %v1264_v19 = vsub.f32 %v3960_v31, %v1218_v18 }
 0x31f   : > { %v1282_v24 = vmul.f32 1.442695, %v1265_v7  ;;  %1253 = vmax.xlane.f32.xlu0 %v1252_v8 }
 0x320   : > { %v1280_v26 = vmul.f32 1.442695, %v1264_v19 }
 0x321   : > { %3454 = vpow2.f32 %v1282_v24  ;;  %v1227_v21 = vpop.xlane.xlu0 %1226  ;;  %1256 = vmax.xlane.f32.xlu1 %v1255_v28 }
 0x322   : > { %3456 = vpow2.f32 %v1280_v26  ;;  %v1267_v22 = vsub.f32 %v3971_v37, %v1227_v21 }
 0x323   : > { %3458 = vpow2.f32 %v1284_v5 }
 0x324   : > { %v1286_v27 = vmul.f32 1.442695, %v1267_v22 }
 0x326   : > { %3460 = vpow2.f32 %v1286_v27 }
 0x32b   : > { %v4056_v29 = vpop.eup %3454 }
 0x32c   : > { %v4058_v31 = vpop.eup %3456 }
 0x32d   : > { %v1360_v32 = vpack.c.bf16 %v4056_v29, %v4058_v31  ;;  %v4062_v33 = vpop.eup %3458 }
 0x32f   : > { %3105 = vmatprep.mubr.msk.bf16.mxu0 %vm936_vm0, %v1360_v32 }
 0x330   : > { %v4065_v34 = vpop.eup %3460 }
 0x331   : > { %v1361_v36 = vpack.c.bf16 %v4065_v34, %v4062_v33 }
 0x332   : > { %3292 = vrot.lane.b32.xlu1 %v3886_v3, %s3628_s22 }
 0x333   : > { %3106 = vmatmul.mubr.msk.bf16.vlgmr.msra.gmra.mrb[12].mxu0 %vm936_vm0, %v1361_v36 }
 0x334   : > { %3118 = vmatpush3.bf16.msra.mxu0 %v3932_v2 }
 0x335   : > { %3287 = vrot.lane.b32.xlu0 %v3886_v3, %s3629_s23 }
 0x393   : > { %v1236_v37 = vpop.xlane.xlu0 %1235 }
 0x394   : > { %v1270_v38 = vsub.f32 %v3977_v40, %v1236_v37 }
 0x395   : > { %v1239_v41 = vpop.xlane.xlu1 %1238 }
 0x396   : > { %v1292_v39 = vmul.f32 1.442695, %v1270_v38  ;;  %v1271_v42 = vsub.f32 %v3983_v44, %v1239_v41 }
 0x398   : > { %3462 = vpow2.f32 %v1292_v39  ;;  %v1294_v50 = vmul.f32 1.442695, %v1271_v42 }
 0x39c   : > { %v1248_v43 = vpop.xlane.xlu0 %1247 }
 0x39d   : > { %v1274_v45 = vsub.f32 %v3989_v48, %v1248_v43 }
 0x39e   : > { %v1251_v46 = vpop.xlane.xlu1 %1250 }
 0x39f   : > { %v1300_v47 = vmul.f32 1.442695, %v1274_v45  ;;  %v1275_v49 = vsub.f32 %v4000_v53, %v1251_v46 }
 0x3a0   : > { %v1230_v2 = vpop.xlane.xlu0 %1229 }
 0x3a1   : > { %3464 = vpow2.f32 %v1300_v47  ;;  %v1302_v51 = vmul.f32 1.442695, %v1275_v49  ;;  %v1268_v3 = vsub.f32 %v3996_v52, %v1230_v2 }
 0x3a2   : > { %v4080_v54 = vpop.eup %3462  ;;  %v1233_v40 = vpop.xlane.xlu1 %1232 }
 0x3a3   : > { %3466 = vpow2.f32 %v1302_v51  ;;  %v1288_v55 = vmul.f32 1.442695, %v1268_v3  ;;  %v1269_v44 = vsub.f32 %v4007_v56, %v1233_v40  ;;  %v1330_v48 = vsel %vm936_vm0, %v4080_v54, 0.0 }
 0x3a4   : > { %3468 = vpow2.f32 %v1294_v50  ;;  %v1242_v57 = vpop.xlane.xlu0 %1241  ;;  %1331 = vadd.xlane.f32.xlu0 %v1330_v48 }
 0x3a5   : > { %3470 = vpow2.f32 %v1288_v55  ;;  %v1290_v53 = vmul.f32 1.442695, %v1269_v44  ;;  %v1272_v59 = vsub.f32 %v4014_v58, %v1242_v57  ;;  %v1312_v57 = vsel %vm936_vm0, %v4058_v31, 0.0 }
 0x3a6   : > { %v1245_v60 = vpop.xlane.xlu1 %1244 }
 0x3a7   : > { %3472 = vpow2.f32 %v1290_v53  ;;  %v1296_v52 = vmul.f32 1.442695, %v1272_v59  ;;  %v1273_v61 = vsub.f32 %v4021_v62, %v1245_v60  ;;  %v1315_v53 = vsel %vm936_vm0, %v4056_v29, 0.0  ;;  %v3358_v29 = vld [vmem:[%s4598_s5] sm:$0xff]  }
 0x3a8   : > { %v1260_v63 = vpop.xlane.xlu0 %1259  ;;  %v1318_v59 = vsel %vm936_vm0, %v4062_v33, 0.0  ;;  %v1321_v60 = vsel %vm936_vm0, %v4065_v34, 0.0  ;;  %v3359_v33 = vld [vmem:[%s4598_s5 + $0x8] sm:$0xff]   ;;  %v3360_v34 = vld [vmem:[%s4598_s5 + $0x10] sm:$0xff]  }
 0x3a9   : > { %3474 = vpow2.f32 %v1296_v52  ;;  %v1298_v0 = vmul.f32 1.442695, %v1273_v61  ;;  %v1278_v56 = vsub.f32 %v4027_v9, %v1260_v63 }
 0x3aa   : > { %v1263_v4 = vpop.xlane.xlu1 %1262 }
 0x3ab   : > { %v3465_v10 = vpop.eup %3464  ;;  %3476 = vpow2.f32 %v1298_v0  ;;  %v1279_v11 = vsub.f32 %v4033_v1, %v1263_v4  ;;  %v1308_v12 = vmul.f32 1.442695, %v1278_v56  ;;  %v3361_v0 = vld [vmem:[%s4598_s5 + $0x18] sm:$0xff]  }
 0x3ac   : > { %v1254_v14 = vpop.xlane.xlu0 %1253  ;;  %v1342_v15 = vsel %vm936_vm0, %v3465_v10, 0.0 }
 0x3ad   : > { %v3467_v58 = vpop.eup %3466  ;;  %v1276_v17 = vsub.f32 %v4040_v13, %v1254_v14  ;;  %1343 = vadd.xlane.f32.xlu0 %v1342_v15  ;;  %v1310_v62 = vmul.f32 1.442695, %v1279_v11  ;;  %3478 = vpow2.f32 %v1308_v12 }
 0x3ae   : > { %v3469_v7 = vpop.eup %3468  ;;  %v1257_v18 = vpop.xlane.xlu1 %1256  ;;  %v1345_v19 = vsel %vm936_vm0, %v3467_v58, 0.0  ;;  %v1365_v49 = vpack.c.bf16 %v3467_v58, %v3465_v10 }
 0x3af   : > { %v3471_v8 = vpop.eup %3470  ;;  %v1304_v9 = vmul.f32 1.442695, %v1276_v17  ;;  %v1277_v24 = vsub.f32 %v4047_v16, %v1257_v18  ;;  %1346 = vadd.xlane.f32.xlu1 %v1345_v19  ;;  %v1363_v36 = vpack.c.bf16 %v3469_v7, %v4080_v54  ;;  %v1333_v47 = vsel %vm936_vm0, %v3469_v7, 0.0 }
 0x3b0   : > { %v3288_v1 = vpop.permute.xlu0 %3287  ;;  %v1324_v26 = vsel %vm936_vm0, %v3471_v8, 0.0 }
 0x3b1   : > { %v3473_v28 = vpop.eup %3472  ;;  %3480 = vpow2.f32 %v1304_v9  ;;  %v1306_v5 = vmul.f32 1.442695, %v1277_v24  ;;  %v3290_v21 = vunpack.i.h.bf16 %v3288_v1  ;;  %v3289_v13 = vunpack.i.l.bf16 %v3288_v1  ;;  %1325 = vadd.xlane.f32.xlu0 %v1324_v26  ;;  %v3363_v26 = vld [vmem:[%s4598_s5 + $0x28] sm:$0xff]  }
 0x3b2   : > { %3482 = vpow2.f32 %v1310_v62  ;;  %v3293_v22 = vpop.permute.xlu1 %3292  ;;  %v1327_v27 = vsel %vm936_vm0, %v3473_v28, 0.0  ;;  %v1362_v32 = vpack.c.bf16 %v3473_v28, %v3471_v8  ;;  %v3362_v62 = vld [vmem:[%s4598_s5 + $0x20] sm:$0xff]  }
 0x3b3   : > { %v3475_v37 = vpop.eup %3474  ;;  %3484 = vpow2.f32 %v1306_v5  ;;  %v1373_v16 = vpack.c.bf16 %v3290_v21, %v3289_v13  ;;  %v3295_v38 = vunpack.i.h.bf16 %v3293_v22  ;;  %v3294_v39 = vunpack.i.l.bf16 %v3293_v22  ;;  %1328 = vadd.xlane.f32.xlu1 %v1327_v27 }
 0x3b4   : > { %3113 = vmatprep.mubr.msk.bf16.mxu1 %vm936_vm0, %v1362_v32  ;;  %v1336_v41 = vsel %vm936_vm0, %v3475_v37, 0.0 }
 0x3b5   : > { %v3477_v42 = vpop.eup %3476  ;;  %v1375_v43 = vpack.c.bf16 %v3295_v38, %v3294_v39  ;;  %3114 = vmatmul.mubr.msk.bf16.vlgmr.msra.gmra.mrb[16].mxu1 %vm936_vm0, %v1363_v36  ;;  %1337 = vadd.xlane.f32.xlu0 %v1336_v41  ;;  %v3364_v39 = vld [vmem:[%s4598_s5 + $0x30] sm:$0xff]  }
 0x3b6   : > { %3126 = vmatpush3.bf16.msra.mxu1 %v3935_v20  ;;  %3119 = vmatprep.subr.bf16.mxu0 %v1373_v16  ;;  %v1339_v45 = vsel %vm936_vm0, %v3477_v42, 0.0  ;;  %v1364_v46 = vpack.c.bf16 %v3477_v42, %v3475_v37 }
 0x3b7   : > { %3120 = vmatpush3.bf16.msra.mxu0 %v1373_v16  ;;  %1340 = vadd.xlane.f32.xlu1 %v1339_v45  ;;  %v3479_v50 = vpop.eup %3478 }
 0x3b8   : > { %3127 = vmatprep.subr.bf16.mxu1 %v1375_v43  ;;  %3121 = vmatprep.mubr.msk.bf16.mxu0 %vm936_vm0, %v1364_v46  ;;  %v1354_v44 = vsel %vm936_vm0, %v3479_v50, 0.0 }
 0x3b9   : > { %1334 = vadd.xlane.f32.xlu0 %v1333_v47  ;;  %3133 = vmatprep.subr.bf16.mxu0 %v3358_v29 }
 0x3ba   : > { %3122 = vmatmul.mubr.msk.bf16.vlgmr.msra.gmra.mrb[16].mxu0 %vm936_vm0, %v1365_v49  ;;  %3128 = vmatpush3.bf16.msra.mxu1 %v1375_v43 }
 0x3bb   : > { %v3481_v2 = vpop.eup %3480  ;;  %3134 = vmatpush3.bf16.msra.mxu0 %v3358_v29 }
 0x3bc   : > { %v3483_v51 = vpop.eup %3482  ;;  %v1348_v20 = vsel %vm936_vm0, %v3481_v2, 0.0  ;;  %3135 = vmatprep.subr.bf16.mxu0 %v3359_v33 }
 0x3bd   : > { %v3485_v3 = vpop.eup %3484  ;;  %1349 = vadd.xlane.f32.xlu0 %v1348_v20  ;;  %v1367_v55 = vpack.c.bf16 %v3483_v51, %v3479_v50  ;;  %v1357_v48 = vsel %vm936_vm0, %v3483_v51, 0.0 }
 0x3be   : > { %v1351_v54 = vsel %vm936_vm0, %v3485_v3, 0.0  ;;  %v1366_v40 = vpack.c.bf16 %v3485_v3, %v3481_v2 }
 0x3bf   : > { %1352 = vadd.xlane.f32.xlu1 %v1351_v54  ;;  %3136 = vmatpush3.bf16.msra.mxu0 %v3359_v33  ;;  %v3365_v54 = vld [vmem:[%s4598_s5 + $0x38] sm:$0xff]  }
 0x3c0   : > { %3129 = vmatprep.mubr.msk.bf16.mxu1 %vm936_vm0, %v1366_v40  ;;  %3137 = vmatprep.subr.bf16.mxu0 %v3360_v34 }
 0x3c1   : > { %1355 = vadd.xlane.f32.xlu0 %v1354_v44  ;;  %3130 = vmatmul.mubr.msk.bf16.vlgmr.msra.gmra.mrb[20].mxu1 %vm936_vm0, %v1367_v55 }
 0x3c2   : > { %2138 = vmatprep.mubr.bf16.mxu1 %v3626_v30 }
 0x3c3   : > { %1358 = vadd.xlane.f32.xlu1 %v1357_v48  ;;  %3138 = vmatpush3.bf16.msra.mxu0 %v3360_v34 }
 0x3c4   : > { %3139 = vmatprep.subr.bf16.mxu0 %v3361_v0 }
 0x3c5   : > { %1313 = vadd.xlane.f32.xlu0 %v1312_v57 }
 0x3c7   : > { %1316 = vadd.xlane.f32.xlu1 %v1315_v53  ;;  %3140 = vmatpush3.bf16.msra.mxu0 %v3361_v0 }
 0x3c8   : > { %3141 = vmatprep.subr.bf16.mxu0 %v3362_v62 }
 0x3c9   : > { %1319 = vadd.xlane.f32.xlu0 %v1318_v59 }
 0x3cb   : > { %1322 = vadd.xlane.f32.xlu1 %v1321_v60  ;;  %3142 = vmatpush3.bf16.msra.mxu0 %v3362_v62 }
 0x3cc   : > { %3143 = vmatprep.subr.bf16.mxu0 %v3363_v26 }
 0x3cf   : > { %3144 = vmatpush3.bf16.msra.mxu0 %v3363_v26 }
 0x3d0   : > { %3145 = vmatprep.subr.bf16.mxu0 %v3364_v39 }
 0x3d3   : > { %3146 = vmatpush3.bf16.msra.mxu0 %v3364_v39 }
 0x3d4   : > { %3147 = vmatprep.subr.bf16.mxu0 %v3365_v54 }
 0x3d7   : > { %3148 = vmatpush3.bf16.msra.mxu0 %v3365_v54 }
 0x406   : > { %v4119_v52 = vpop.f32.mrb[12].mxu0 }
 0x407   : > { %v4121_v61 = vpop.f32.mrb[13].mxu0 }
 0x408   : > { %v4123_v63 = vpop.f32.mrb[14].mxu0 }
 0x409   : > { %v4125_v31 = vpop.f32.mrb[15].mxu0 }
 0x431   : > { %v1332_v56 = vpop.xlane.xlu0 %1331 }
 0x432   : > { %3486 = vrcp.f32 %v1332_v56 }
 0x43a   : > { %v1344_v4 = vpop.xlane.xlu0 %1343 }
 0x43c   : > { %v1347_v11 = vpop.xlane.xlu1 %1346  ;;  %v3487_v18 = vpop.eup %3486 }
 0x43e   : > { %v1326_v10 = vpop.xlane.xlu0 %1325 }
 0x43f   : > { %3488 = vrcp.f32 %v1326_v10 }
 0x440   : > { %v1329_v14 = vpop.xlane.xlu1 %1328 }
 0x442   : > { %v1338_v12 = vpop.xlane.xlu0 %1337 }
 0x444   : > { %v1341_v58 = vpop.xlane.xlu1 %1340 }
 0x446   : > { %v1335_v15 = vpop.xlane.xlu0 %1334 }
 0x447   : > { %3490 = vrcp.f32 %v1335_v15 }
 0x448   : > { %3492 = vrcp.f32 %v1329_v14 }
 0x449   : > { %3494 = vrcp.f32 %v1344_v4  ;;  %v3489_v9 = vpop.eup %3488 }
 0x44a   : > { %v1350_v17 = vpop.xlane.xlu0 %1349  ;;  %3496 = vrcp.f32 %v1347_v11 }
 0x44b   : > { %3498 = vrcp.f32 %v1338_v12 }
 0x44c   : > { %v1353_v7 = vpop.xlane.xlu1 %1352  ;;  %3500 = vrcp.f32 %v1341_v58 }
 0x44d   : > { %3502 = vrcp.f32 %v1350_v17 }
 0x44e   : > { %v1356_v19 = vpop.xlane.xlu0 %1355 }
 0x44f   : > { %3504 = vrcp.f32 %v1356_v19 }
 0x450   : > { %v1359_v24 = vpop.xlane.xlu1 %1358 }
 0x451   : > { %v3491_v28 = vpop.eup %3490  ;;  %3506 = vrcp.f32 %v1359_v24 }
 0x452   : > { %v3493_v21 = vpop.eup %3492  ;;  %3508 = vrcp.f32 %v1353_v7  ;;  %v1314_v11 = vpop.xlane.xlu0 %1313 }
 0x453   : > { %v3495_v37 = vpop.eup %3494  ;;  %3510 = vrcp.f32 %v1314_v11 }
 0x454   : > { %v3497_v41 = vpop.eup %3496  ;;  %v1317_v12 = vpop.xlane.xlu1 %1316 }
 0x455   : > { %v3499_v45 = vpop.eup %3498  ;;  %3512 = vrcp.f32 %v1317_v12 }
 0x456   : > { %v3501_v47 = vpop.eup %3500  ;;  %v1320_v14 = vpop.xlane.xlu0 %1319 }
 0x457   : > { %v3503_v55 = vpop.eup %3502  ;;  %3514 = vrcp.f32 %v1320_v14 }
 0x458   : > { %v1323_v15 = vpop.xlane.xlu1 %1322 }
 0x459   : > { %v3505_v48 = vpop.eup %3504  ;;  %3516 = vrcp.f32 %v1323_v15  ;;  %v3561_v15 = vld [vmem:[%s3759_s15 + $0x10] sm:$0xff] }
 0x45b   : > { %v3507_v53 = vpop.eup %3506 }
 0x45c   : > { %v3509_v60 = vpop.eup %3508 }
 0x45d   : > { %v3511_v17 = vpop.eup %3510 }
 0x45f   : > { %v3513_v7 = vpop.eup %3512 }
 0x488   : > { %v3115_v8 = vpop.f32.mrb[16].mxu1 }
 0x489   : > { %v1471_v1 = vpop.f32.mrb[17].mxu1  ;;  %v1609_v13 = vmul.f32 %v3487_v18, %v3115_v8  ;;  %v3515_v18 = vpop.eup %3514 }
 0x48a   : > { %v3116_v5 = vpop.f32.mrb[18].mxu1  ;;  %v1605_v32 = vmul.f32 %v3489_v9, %v1471_v1  ;;  %v3517_v8 = vpop.eup %3516 }
 0x48b   : > { %v1611_v22 = vmul.f32 %v3491_v28, %v3116_v5  ;;  %v1474_v27 = vpop.f32.mrb[19].mxu1  ;;  %v1601_v5 = vmul.f32 %v3515_v18, %v4119_v52  ;;  %v3369_v18 = vld [vmem:[%s4602_s9 + $0x8] ss:$16 sps:$4 sm:$0xff]  }
 0x48c   : > { %v1607_v36 = vmul.f32 %v3493_v21, %v1474_v27  ;;  %v1603_v21 = vmul.f32 %v3517_v8, %v4123_v63  ;;  %v3374_v8 = vld [vmem:[%s4602_s9 + $0x24] ss:$16 sps:$4 sm:$0xff]  }
 0x48d   : > { %v3296_v16 = vpack.i.bf16 %v1611_v22, %v1609_v13  ;;  %v3123_v38 = vpop.f32.mrb[16].mxu0  ;;  %v1597_v13 = vmul.f32 %v3511_v17, %v4121_v61  ;;  %v1599_v22 = vmul.f32 %v3513_v7, %v4125_v31  ;;  %v3366_v7 = vld [vmem:[%s4602_s9] ss:$16 sps:$4 sm:$0xff]  }
 0x48e   : > { %v3306_v42 = vpack.i.bf16 %v1607_v36, %v1605_v32  ;;  %v1526_v43 = vpop.f32.mrb[17].mxu0  ;;  %v1617_v49 = vmul.f32 %v3495_v37, %v3123_v38 }
 0x48f   : > { %v3124_v46 = vpop.f32.mrb[18].mxu0  ;;  %3297 = vrot.lane.b32.xlu1 %v3296_v16, %s3628_s22  ;;  %v1613_v51 = vmul.f32 %v3499_v45, %v1526_v43 }
 0x490   : > { %v1619_v50 = vmul.f32 %v3497_v41, %v3124_v46  ;;  %v1529_v2 = vpop.f32.mrb[19].mxu0  ;;  %3307 = vrot.lane.b32.xlu0 %v3306_v42, %s3628_s22  ;;  %s4616_s22 = smov 96  }
 0x491   : > { %v1615_v20 = vmul.f32 %v3501_v47, %v1529_v2 }
 0x492   : > { %v3301_v3 = vpack.i.bf16 %v1619_v50, %v1617_v49 }
 0x493   : > { %v3311_v40 = vpack.i.bf16 %v1615_v20, %v1613_v51 }
 0x494   : > { %3302 = vrot.lane.b32.xlu1 %v3301_v3, %s3629_s23  ;;  %v3131_v44 = vpop.f32.mrb[20].mxu1 }
 0x495   : > { %v1581_v57 = vpop.f32.mrb[21].mxu1  ;;  %v1625_v29 = vmul.f32 %v3505_v48, %v3131_v44 }
 0x496   : > { %v3132_v59 = vpop.f32.mrb[22].mxu1  ;;  %v1621_v0 = vmul.f32 %v3503_v55, %v1581_v57 }
 0x497   : > { %v1627_v33 = vmul.f32 %v3507_v53, %v3132_v59  ;;  %v1584_v34 = vpop.f32.mrb[23].mxu1  ;;  %v3558_v59 = vld [vmem:[%s3759_s15] sm:$0xff] }
 0x498   : > { %3312 = vrot.lane.b32.xlu1 %v3311_v40, %s3629_s23  ;;  %v1623_v56 = vmul.f32 %v3509_v60, %v1584_v34  ;;  %v2858_v40 = vld [vmem:[%s4599_s6] ss:$0 sm:$0xff]  ;;  %v3559_v34 = vld [vmem:[%s3759_s15 + $0x8] sm:$0xff] }
 0x499   : > { %v3321_v4 = vpack.i.bf16 %v1627_v33, %v1625_v29 }
 0x49a   : > { %v3316_v10 = vpack.i.bf16 %v1623_v56, %v1621_v0 }
 0x49c   : > { %3322 = vrot.lane.b32.xlu1 %v3321_v4, %s4616_s22  ;;  %3317 = vrot.lane.b32.xlu0 %v3316_v10, %s4616_s22  ;;  %v3560_v4 = vld [vmem:[%s3759_s15 + $0x18] sm:$0xff]  ;;  %s433_s15 = scalar_lea.vmem [#allocation2], %s2813_s16  ;;  %s2940_s22 = sshll.u32 %s3724_s29, 9 }
 0x49d   : > { %s2747_s20 = sshll.u32 %s433_s15, 4  ;;  %s4548_s24 = scalar_lea.hbm %s4606_s13, %s2940_s22  ;;  %s4542_s20 = int_to_ptr.vmem [resolvable:$true] %s2747_s20 }
 0x49e   : > { %s3562_s29 = scalar_lea.vmem %s4542_s20, 512  ;;  %s3568_s16 = scalar_lea.vmem %s3567_s27, 1024 }
 0x49f   : > { %p3563_p11 = scmp.ne.s32.totalorder %s4542_s20, %s3562_s29  ;;  %p3569_p0 = scmp.lt.s32.totalorder %s4542_s20, %s3567_s27 }
 0x4a0   : > { %p3570_p1 = scmp.lt.s32.totalorder %s3568_s16, %s3562_s29 }
 0x4a1   : > { %p3564_p12 = pnand %p3563_p11, %p3741_p5 }
 0x4a2   : > { %p3571_p2 = por %p3570_p1, %p3569_p0 }
 0x4a3   : > { %p3565_p13 = pneg %p3564_p12 }
 0x4a5   : > { %p3572_p3 = pnand %p3571_p2, %p3565_p13 }
 0x501   : > { %v3298_v58 = vpop.permute.xlu1 %3297 }
 0x502   : > { %v3308_v19 = vpop.permute.xlu0 %3307  ;;  %v3300_v9 = vunpack.i.h.bf16 %v3298_v58  ;;  %v3299_v24 = vunpack.i.l.bf16 %v3298_v58 }
 0x503   : > { %v3310_v1 = vunpack.i.h.bf16 %v3308_v19  ;;  %v3309_v26 = vunpack.i.l.bf16 %v3308_v19  ;;  %v3371_v19 = vld [vmem:[%s4602_s9 + $0xc] ss:$16 sps:$4 sm:$0xff]  }
 0x504   : > { %v1679_v16 = vsel %vm936_vm0, %v1603_v21, %v3300_v9  ;;  %v1678_v38 = vsel %vm936_vm0, %v1601_v5, %v3299_v24  ;;  %2159 = vmatprep.subr.bf16.mxu0 %v3371_v19  ;;  %v3377_v9 = vld [vmem:[%s4602_s9 + $0x2c] ss:$16 sps:$4 sm:$0xff]   ;;  %v3372_v24 = vld [vmem:[%s4602_s9 + $0x20] ss:$16 sps:$4 sm:$0xff]   ;;  %v3381_v21 = vld [vmem:[%s4602_s9 + $0x48] ss:$16 sps:$4 sm:$0xff]  }
 0x505   : > { %v1676_v39 = vsel %vm936_vm0, %v1597_v13, %v3309_v26  ;;  %v1677_v52 = vsel %vm936_vm0, %v1599_v22, %v3310_v1  ;;  %v3375_v1 = vld [vmem:[%s4602_s9 + $0x28] ss:$16 sps:$4 sm:$0xff]   ;;  %v3380_v26 = vld [vmem:[%s4602_s9 + $0x44] ss:$16 sps:$4 sm:$0xff]   ;;  %v3378_v5 = vld [vmem:[%s4602_s9 + $0x40] ss:$16 sps:$4 sm:$0xff]  }
 0x506   : > { %v3303_v62 = vpop.permute.xlu1 %3302  ;;  %v3386_v13 = vld [vmem:[%s4602_s9 + $0x64] ss:$16 sps:$4 sm:$0xff]   ;;  %v3389_v22 = vld [vmem:[%s4602_s9 + $0x6c] ss:$16 sps:$4 sm:$0xff]  }
 0x507   : > { %v3305_v27 = vunpack.i.h.bf16 %v3303_v62  ;;  %v3304_v32 = vunpack.i.l.bf16 %v3303_v62  ;;  %v3368_v62 = vld [vmem:[%s4602_s9 + $0x4] ss:$16 sps:$4 sm:$0xff]  }
 0x508   : > { %2106 = vmatprep.subr.bf16.mxu1 %v3368_v62 }
 0x509   : > { %v1683_v45 = vsel %vm1680_vm5, %v1678_v38, %v3304_v32  ;;  %v1684_v46 = vsel %vm1680_vm5, %v1679_v16, %v3305_v27  ;;  %2107 = vmatpush1.bf16.msra.mxu1 %v3366_v7  ;;  %v3384_v27 = vld [vmem:[%s4602_s9 + $0x60] ss:$16 sps:$4 sm:$0xff]   ;;  %v3387_v32 = vld [vmem:[%s4602_s9 + $0x68] ss:$16 sps:$4 sm:$0xff]  }
 0x50a   : > { %v3313_v28 = vpop.permute.xlu1 %3312  ;;  %2108 = vmatprep.subr.bf16.mxu1 %v3374_v8  ;;  %v3390_v16 = vld [vmem:[%s4602_s9 + $0x80] ss:$16 sps:$4 sm:$0xff]   ;;  %v3393_v38 = vld [vmem:[%s4602_s9 + $0x88] ss:$16 sps:$4 sm:$0xff]  }
 0x50b   : > { %v3315_v36 = vunpack.i.h.bf16 %v3313_v28  ;;  %v3314_v37 = vunpack.i.l.bf16 %v3313_v28  ;;  %v3383_v28 = vld [vmem:[%s4602_s9 + $0x4c] ss:$16 sps:$4 sm:$0xff]  }
 0x50d   : > { %v1682_v47 = vsel %vm1680_vm5, %v1677_v52, %v3315_v36  ;;  %v1681_v49 = vsel %vm1680_vm5, %v1676_v39, %v3314_v37  ;;  %2109 = vmatpush1.bf16.msra.mxu1 %v3372_v24  ;;  %v3392_v36 = vld [vmem:[%s4602_s9 + $0x84] ss:$16 sps:$4 sm:$0xff]   ;;  %v3395_v37 = vld [vmem:[%s4602_s9 + $0x8c] ss:$16 sps:$4 sm:$0xff]   ;;  %v3396_v39 = vld [vmem:[%s4602_s9 + $0xa0] ss:$16 sps:$4 sm:$0xff]  }
 0x50e   : > { %v3323_v41 = vpop.permute.xlu1 %3322  ;;  %v3318_v63 = vpop.permute.xlu0 %3317  ;;  %2110 = vmatprep.subr.bf16.mxu1 %v3380_v26  ;;  %v3398_v52 = vld [vmem:[%s4602_s9 + $0xa4] ss:$16 sps:$4 sm:$0xff]   ;;  %v2867_v26 = vld [vmem:[%s4600_s7] ss:$0 sm:$0xff] }
 0x50f   : > { %v3325_v42 = vunpack.i.h.bf16 %v3323_v41  ;;  %v3324_v61 = vunpack.i.l.bf16 %v3323_v41  ;;  %v3320_v43 = vunpack.i.h.bf16 %v3318_v63  ;;  %v3319_v31 = vunpack.i.l.bf16 %v3318_v63  ;;  %v3399_v41 = vld [vmem:[%s4602_s9 + $0xa8] ss:$16 sps:$4 sm:$0xff]   ;;  %v3401_v63 = vld [vmem:[%s4602_s9 + $0xac] ss:$16 sps:$4 sm:$0xff]  }
 0x511   : > { %v1689_v50 = vsel %vm1685_vm6, %v1684_v46, %v3325_v42  ;;  %v1688_v2 = vsel %vm1685_vm6, %v1683_v45, %v3324_v61  ;;  %v1686_v51 = vsel %vm1685_vm6, %v1681_v49, %v3319_v31  ;;  %v1687_v20 = vsel %vm1685_vm6, %v1682_v47, %v3320_v43  ;;  %2111 = vmatpush1.bf16.msra.mxu1 %v3378_v5  ;;  %v3404_v42 = vld [vmem:[%s4602_s9 + $0xc4] ss:$16 sps:$4 sm:$0xff]   ;;  %v3407_v61 = vld [vmem:[%s4602_s9 + $0xcc] ss:$16 sps:$4 sm:$0xff]   ;;  %v3402_v43 = vld [vmem:[%s4602_s9 + $0xc0] ss:$16 sps:$4 sm:$0xff]  }
 0x512   : > { %v1691_v3 = vpack.c.bf16 %v1689_v50, %v1688_v2  ;;  %v1690_v54 = vpack.c.bf16 %v1687_v20, %v1686_v51  ;;  %2112 = vmatprep.subr.bf16.mxu1 %v3386_v13  ;;  %v3405_v31 = vld [vmem:[%s4602_s9 + $0xc8] ss:$16 sps:$4 sm:$0xff]   ;;  %v3410_v45 = vld [vmem:[%s4602_s9 + $0xe4] ss:$16 sps:$4 sm:$0xff]   ;;  %v3413_v46 = vld [vmem:[%s4602_s9 + $0xec] ss:$16 sps:$4 sm:$0xff]  }
 0x513   : > { %v3408_v47 = vld [vmem:[%s4602_s9 + $0xe0] ss:$16 sps:$4 sm:$0xff]   ;;  %v3411_v49 = vld [vmem:[%s4602_s9 + $0xe8] ss:$16 sps:$4 sm:$0xff]  }
 0x514   : > { %3149 = vmatprep.mubr.bf16.mxu0 %v1690_v54 }
 0x515   : > { %3150 = vmatmul.mubr.bf16.vlgmr.msra.gmra.mrb[20].mxu0 %v1691_v3  ;;  %2113 = vmatpush1.bf16.msra.mxu1 %v3384_v27  ;;  %v2868_v27 = vld [vmem:[%s4601_s8] ss:$0 sm:$0xff] }
 0x516   : > { %2191 = vmatprep.mubr.bf16.mxu0 %v3626_v30  ;;  %2160 = vmatpush1.bf16.msra.mxu0 %v3369_v18 }
 0x517   : > { %2161 = vmatprep.subr.bf16.mxu0 %v3377_v9  ;;  %2114 = vmatprep.subr.bf16.mxu1 %v3392_v36 }
 0x519   : > { %2115 = vmatpush1.bf16.msra.mxu1 %v3390_v16 }
 0x51a   : > { %2162 = vmatpush1.bf16.msra.mxu0 %v3375_v1  ;;  %2116 = vmatprep.subr.bf16.mxu1 %v3398_v52 }
 0x51b   : > { %2163 = vmatprep.subr.bf16.mxu0 %v3383_v28 }
 0x51d   : > { %2117 = vmatpush1.bf16.msra.mxu1 %v3396_v39 }
 0x51e   : > { %2164 = vmatpush1.bf16.msra.mxu0 %v3381_v21  ;;  %2118 = vmatprep.subr.bf16.mxu1 %v3404_v42 }
 0x51f   : > { %2165 = vmatprep.subr.bf16.mxu0 %v3389_v22 }
 0x521   : > { %2119 = vmatpush1.bf16.msra.mxu1 %v3402_v43 }
 0x522   : > { %2166 = vmatpush1.bf16.msra.mxu0 %v3387_v32  ;;  %2120 = vmatprep.subr.bf16.mxu1 %v3410_v45 }
 0x523   : > { %2167 = vmatprep.subr.bf16.mxu0 %v3395_v37 }
 0x525   : > { %2121 = vmatpush1.bf16.msra.mxu1 %v3408_v47  ;;  %v3415_v47 = vld [vmem:[%s4604_s11 + $0xc0] sm:$0xff]  }
 0x526   : > { %2168 = vmatpush1.bf16.msra.mxu0 %v3393_v38 }
 0x527   : > { %2169 = vmatprep.subr.bf16.mxu0 %v3401_v63 }
 0x52a   : > { %2170 = vmatpush1.bf16.msra.mxu0 %v3399_v41 }
 0x52b   : > { %2171 = vmatprep.subr.bf16.mxu0 %v3407_v61 }
 0x52e   : > { %2172 = vmatpush1.bf16.msra.mxu0 %v3405_v31 }
 0x52f   : > { %2173 = vmatprep.subr.bf16.mxu0 %v3413_v46  ;;  %v3414_v46 = vld [vmem:[%s4604_s11 + $0x40] sm:$0xff]  }
 0x530   : > { %2993 = vmatprep.subr.bf16.mxu1 %v3414_v46 }
 0x532   : > { %2174 = vmatpush1.bf16.msra.mxu0 %v3411_v49  ;;  %v3416_v49 = vld [vmem:[%s4604_s11] sm:$0xff]  }
 0x533   : > { %3021 = vmatprep.subr.bf16.mxu0 %v3415_v47 }
 0x5e8   : > { %v3151_v55 = vpop.f32.mrb[20].mxu0 }
 0x5e9   : > { %v1797_v44 = vpop.f32.mrb[21].mxu0  ;;  %v1806_v11 = vadd.f32 %v3151_v55, %v2858_v40 }
 0x5ea   : > { %v1798_v48 = vadd.f32 %v2858_v40, %v1797_v44  ;;  %v3152_v57 = vpop.f32.mrb[22].mxu0 }
 0x5eb   : > { %v1800_v53 = vpop.f32.mrb[23].mxu0  ;;  %v1809_v33 = vadd.f32 %v3152_v57, %v2858_v40  ;;  %v4192_v58 = vadd.f32 %v3561_v15, %v1806_v11 }
 0x5ec   : > { %v4174_v60 = vadd.f32 %v3558_v59, %v1798_v48  ;;  %v1801_v29 = vadd.f32 %v2858_v40, %v1800_v53 }
 0x5ed   : > { %v4184_v10 = vadd.f32 %v3560_v4, %v1809_v33  ;;  %v1832_v17 = vmul.f32 %v4192_v58, %v4192_v58 }
 0x5ee   : > { %v4177_v0 = vadd.f32 %v3559_v34, %v1801_v29  ;;  %1818 = vadd.xlane.f32.xlu0 %v4174_v60  ;;  %v1830_v56 = vmul.f32 %v4174_v60, %v4174_v60 }
 0x5ef   : > { %v1833_v14 = vmul.f32 %v4184_v10, %v4184_v10 }
 0x5f0   : > { %1820 = vadd.xlane.f32.xlu1 %v4177_v0  ;;  %v1831_v12 = vmul.f32 %v4177_v0, %v4177_v0 }
 0x5f2   : > { %1834 = vadd.xlane.f32.xlu0 %v1830_v56 }
 0x5f4   : > { %1824 = vadd.xlane.f32.xlu1 %v4184_v10 }
 0x5f6   : > { %1836 = vadd.xlane.f32.xlu0 %v1831_v12 }
 0x5f8   : > { %1840 = vadd.xlane.f32.xlu1 %v1833_v14 }
 0x5fa   : > { %1822 = vadd.xlane.f32.xlu0 %v4192_v58 }
 0x5fe   : > { %1838 = vadd.xlane.f32.xlu0 %v1832_v17 }
 0x67b   : > { %v1819_v50 = vpop.xlane.xlu0 %1818 }
 0x67c   : > { %v1826_v2 = vmul.f32 0.0078125, %v1819_v50  ;;  %v3418_v50 = vld [vmem:[%s4604_s11 + $0x48] sm:$0xff]  }
 0x67d   : > { %v1821_v51 = vpop.xlane.xlu1 %1820 }
 0x67e   : > { %v1846_v3 = vmul.f32 %v1826_v2, %v1826_v2  ;;  %v1827_v54 = vmul.f32 0.0078125, %v1821_v51  ;;  %v1854_v8 = vsub.f32 %v4174_v60, %v1826_v2  ;;  %v3419_v2 = vld [vmem:[%s4604_s11 + $0xc8] sm:$0xff]  }
 0x67f   : > { %v1835_v20 = vpop.xlane.xlu0 %1834  ;;  %v3420_v51 = vld [vmem:[%s4604_s11 + $0x8] sm:$0xff]  }
 0x680   : > { %v1842_v40 = vmul.f32 0.0078125, %v1835_v20  ;;  %v1847_v53 = vmul.f32 %v1827_v54, %v1827_v54  ;;  %v1855_v28 = vsub.f32 %v4177_v0, %v1827_v54  ;;  %v3421_v20 = vld [vmem:[%s4604_s11 + $0x88] sm:$0xff]   ;;  %v3423_v54 = vld [vmem:[%s4604_s11 + $0xd0] sm:$0xff]  }
 0x681   : > { %v1825_v55 = vpop.xlane.xlu1 %1824 }
 0x682   : > { %v1850_v44 = vsub.f32 %v1842_v40, %v1846_v3  ;;  %v1829_v48 = vmul.f32 0.0078125, %v1825_v55  ;;  %v3422_v3 = vld [vmem:[%s4604_s11 + $0x50] sm:$0xff]  }
 0x683   : > { %v1837_v57 = vpop.xlane.xlu0 %1836  ;;  %v3424_v40 = vld [vmem:[%s4604_s11 + $0x10] sm:$0xff]  }
 0x684   : > { %v1858_v59 = vadd.f32 1e-05, %v1850_v44  ;;  %v1843_v29 = vmul.f32 0.0078125, %v1837_v57  ;;  %v1849_v34 = vmul.f32 %v1829_v48, %v1829_v48  ;;  %v1857_v32 = vsub.f32 %v4184_v10, %v1829_v48  ;;  %v3425_v55 = vld [vmem:[%s4604_s11 + $0x90] sm:$0xff]   ;;  %v3426_v44 = vld [vmem:[%s4604_s11 + $0x58] sm:$0xff]  }
 0x685   : > { %v1841_v33 = vpop.xlane.xlu1 %1840  ;;  %v3427_v48 = vld [vmem:[%s4604_s11 + $0xd8] sm:$0xff]  }
 0x686   : > { %3518 = vrsqrt.f32 %v1858_v59  ;;  %v1851_v56 = vsub.f32 %v1843_v29, %v1847_v53  ;;  %v1845_v4 = vmul.f32 0.0078125, %v1841_v33  ;;  %v3428_v57 = vld [vmem:[%s4604_s11 + $0x18] sm:$0xff]   ;;  %v3430_v59 = vld [vmem:[%s4604_s11 + $0x60] sm:$0xff]  }
 0x687   : > { %v1823_v11 = vpop.xlane.xlu0 %1822  ;;  %v3429_v53 = vld [vmem:[%s4604_s11 + $0x98] sm:$0xff]   ;;  %v3431_v29 = vld [vmem:[%s4604_s11 + $0xe0] sm:$0xff]  }
 0x688   : > { %v1859_v12 = vadd.f32 1e-05, %v1851_v56  ;;  %v1853_v14 = vsub.f32 %v1845_v4, %v1849_v34  ;;  %v1828_v15 = vmul.f32 0.0078125, %v1823_v11  ;;  %v3432_v33 = vld [vmem:[%s4604_s11 + $0x20] sm:$0xff]   ;;  %v3434_v56 = vld [vmem:[%s4604_s11 + $0x68] sm:$0xff]  }
 0x689   : > { %v3433_v34 = vld [vmem:[%s4604_s11 + $0xa0] sm:$0xff]   ;;  %v3435_v4 = vld [vmem:[%s4604_s11 + $0xe8] sm:$0xff]  }
 0x68a   : > { %3520 = vrsqrt.f32 %v1859_v12  ;;  %v1861_v17 = vadd.f32 1e-05, %v1853_v14  ;;  %v1848_v62 = vmul.f32 %v1828_v15, %v1828_v15  ;;  %v1856_v39 = vsub.f32 %v4192_v58, %v1828_v15  ;;  %v3436_v11 = vld [vmem:[%s4604_s11 + $0x28] sm:$0xff]   ;;  %v3438_v14 = vld [vmem:[%s4604_s11 + $0x70] sm:$0xff]  }
 0x68b   : > { %v1839_v7 = vpop.xlane.xlu0 %1838  ;;  %v3437_v12 = vld [vmem:[%s4604_s11 + $0xa8] sm:$0xff]   ;;  %v3439_v15 = vld [vmem:[%s4604_s11 + $0xf0] sm:$0xff]  }
 0x68c   : > { %3522 = vrsqrt.f32 %v1861_v17  ;;  %v1844_v18 = vmul.f32 0.0078125, %v1839_v7  ;;  %v3440_v17 = vld [vmem:[%s4604_s11 + $0x30] sm:$0xff]  }
 0x68d   : > { %v3441_v7 = vld [vmem:[%s4604_s11 + $0xb0] sm:$0xff]  }
 0x68e   : > { %v1852_v19 = vsub.f32 %v1844_v18, %v1848_v62  ;;  %v3442_v62 = vld [vmem:[%s4604_s11 + $0x78] sm:$0xff]  }
 0x68f   : > { %v3443_v18 = vld [vmem:[%s4604_s11 + $0xf8] sm:$0xff]  }
 0x690   : > { %v3519_v9 = vpop.eup %3518  ;;  %v1860_v24 = vadd.f32 1e-05, %v1852_v19  ;;  %v3444_v19 = vld [vmem:[%s4604_s11 + $0x38] sm:$0xff]  }
 0x691   : > { %v1866_v1 = vmul.f32 %v3519_v9, %v1854_v8  ;;  %v3445_v8 = vld [vmem:[%s4604_s11 + $0xb8] sm:$0xff]   ;;  %v1924_v9 = vld [vmem:[%s4603_s10] sm:$0xf] }
 0x692   : > { %3524 = vrsqrt.f32 %v1860_v24  ;;  %v4406_v24 = vrot.slane %v1924_v9, %v557_v6 }
 0x693   : > { %v1876_v13 = vmul.f32 %v2867_v26, %v1866_v1  ;;  %v4410_v1 = vrot.slane %v1924_v9, %v565_v35 }
 0x694   : > { %v3521_v5 = vpop.eup %3520 }
 0x695   : > { %v1867_v21 = vmul.f32 %v3521_v5, %v1855_v28  ;;  %v1886_v37 = vadd.f32 %v2868_v27, %v1876_v13 }
 0x696   : > { %v3523_v22 = vpop.eup %3522 }
 0x697   : > { %v1877_v36 = vmul.f32 %v2867_v26, %v1867_v21  ;;  %v1869_v38 = vmul.f32 %v3523_v22, %v1857_v32  ;;  %v4415_v21 = vrot.slane %v1924_v9, %v561_v25 }
 0x699   : > { %v1887_v16 = vadd.f32 %v2868_v27, %v1877_v36  ;;  %v1879_v42 = vmul.f32 %v2867_v26, %v1869_v38 }
 0x69b   : > { %v1890_v52 = vpack.c.bf16 %v1887_v16, %v1886_v37  ;;  %v1889_v31 = vadd.f32 %v2868_v27, %v1879_v42 }
 0x69c   : > { %v3525_v41 = vpop.eup %3524 }
 0x69d   : > { %2139 = vmatmul.mubr.bf16.vlgmr.msra.gmra.mrb[24].mxu1 %v1890_v52  ;;  %2192 = vmatmul.mubr.bf16.vlgmr.msra.gmra.mrb[24].mxu0 %v1890_v52  ;;  %v1868_v63 = vmul.f32 %v3525_v41, %v1856_v39 }
 0x69e   : > { %2148 = vmatprep.mubr.bf16.mxu1 %v3626_v30  ;;  %2201 = vmatprep.mubr.bf16.mxu0 %v3626_v30  ;;  %v3417_v30 = vld [vmem:[%s4604_s11 + $0x80] sm:$0xff]  }
 0x69f   : > { %v1878_v61 = vmul.f32 %v2867_v26, %v1868_v63  ;;  %2994 = vmatpush3.bf16.msra.mxu1 %v3416_v49  ;;  %3022 = vmatpush3.bf16.msra.mxu0 %v3417_v30  ;;  %v1940_v26 = vsub.s32 3, %v3867_v23 }
 0x6a0   : > { %2995 = vmatprep.subr.bf16.mxu1 %v3418_v50  ;;  %3023 = vmatprep.subr.bf16.mxu0 %v3419_v2 }
 0x6a1   : > { %v1888_v43 = vadd.f32 %v2868_v27, %v1878_v61  ;;  %v4419_v6 = vrot.slane %v1924_v9, %v1940_v26 }
 0x6a3   : > { %v1891_v45 = vpack.c.bf16 %v1889_v31, %v1888_v43  ;;  %2996 = vmatpush3.bf16.msra.mxu1 %v3420_v51  ;;  %3024 = vmatpush3.bf16.msra.mxu0 %v3421_v20 }
 0x6a4   : > { %2997 = vmatprep.subr.bf16.mxu1 %v3422_v3  ;;  %3025 = vmatprep.subr.bf16.mxu0 %v3423_v54 }
 0x6a5   : > { %2149 = vmatmul.mubr.bf16.gmra.mrb[28].mxu1 %v1891_v45  ;;  %2202 = vmatmul.mubr.bf16.gmra.mrb[28].mxu0 %v1891_v45 }
 0x6a7   : > { %2998 = vmatpush3.bf16.msra.mxu1 %v3424_v40  ;;  %3026 = vmatpush3.bf16.msra.mxu0 %v3425_v55 }
 0x6a8   : > { %2999 = vmatprep.subr.bf16.mxu1 %v3426_v44  ;;  %3027 = vmatprep.subr.bf16.mxu0 %v3427_v48 }
 0x6ab   : > { %3000 = vmatpush3.bf16.msra.mxu1 %v3428_v57  ;;  %3028 = vmatpush3.bf16.msra.mxu0 %v3429_v53 }
 0x6ac   : > { %3001 = vmatprep.subr.bf16.mxu1 %v3430_v59  ;;  %3029 = vmatprep.subr.bf16.mxu0 %v3431_v29 }
 0x6af   : > { %3002 = vmatpush3.bf16.msra.mxu1 %v3432_v33  ;;  %3030 = vmatpush3.bf16.msra.mxu0 %v3433_v34 }
 0x6b0   : > { %3003 = vmatprep.subr.bf16.mxu1 %v3434_v56  ;;  %3031 = vmatprep.subr.bf16.mxu0 %v3435_v4 }
 0x6b3   : > { %3004 = vmatpush3.bf16.msra.mxu1 %v3436_v11  ;;  %3032 = vmatpush3.bf16.msra.mxu0 %v3437_v12 }
 0x6b4   : > { %3005 = vmatprep.subr.bf16.mxu1 %v3438_v14  ;;  %3033 = vmatprep.subr.bf16.mxu0 %v3439_v15 }
 0x6b7   : > { %3006 = vmatpush3.bf16.msra.mxu1 %v3440_v17  ;;  %3034 = vmatpush3.bf16.msra.mxu0 %v3441_v7 }
 0x6b8   : > { %3007 = vmatprep.subr.bf16.mxu1 %v3442_v62  ;;  %3035 = vmatprep.subr.bf16.mxu0 %v3443_v18 }
 0x6bb   : > { %3008 = vmatpush3.bf16.msra.mxu1 %v3444_v19  ;;  %3036 = vmatpush3.bf16.msra.mxu0 %v3445_v8 }
 0x770   : > { %v2140_v28 = vpop.f32.mrb[24].mxu1  ;;  %v2193_v5 = vpop.f32.mrb[24].mxu0 }
 0x771   : > { %v2141_v13 = vadd.f32 %v2140_v28, %v4406_v24  ;;  %v2194_v22 = vadd.f32 %v2193_v5, %v4410_v1  ;;  %v2142_v27 = vpop.f32.mrb[25].mxu1  ;;  %v2195_v32 = vpop.f32.mrb[25].mxu0 }
 0x772   : > { %v2144_v36 = vpop.f32.mrb[26].mxu1  ;;  %v2197_v37 = vpop.f32.mrb[26].mxu0  ;;  %v4422_v38 = vadd.f32 %v2142_v27, %v4415_v21  ;;  %v4432_v61 = vadd.f32 %v2195_v32, %v4419_v6 }
 0x773   : > { %v2228_v35 = vmul.f32 0.044715, %v2141_v13  ;;  %v2230_v16 = vmul.f32 0.044715, %v2194_v22  ;;  %v2145_v39 = vadd.f32 %v2144_v36, %v4406_v24  ;;  %v4426_v23 = vadd.f32 %v2197_v37, %v4410_v1  ;;  %v2146_v25 = vpop.f32.mrb[27].mxu1  ;;  %v2199_v52 = vpop.f32.mrb[27].mxu0 }
 0x774   : > { %v4429_v42 = vadd.f32 %v2146_v25, %v4415_v21  ;;  %v4435_v31 = vadd.f32 %v2199_v52, %v4419_v6  ;;  %v4437_v45 = vmul.f32 0.5, %v2141_v13  ;;  %v2229_v30 = vmul.f32 0.044715, %v4422_v38 }
 0x775   : > { %v2244_v41 = vmul.f32 %v2228_v35, %v2141_v13  ;;  %v2246_v63 = vmul.f32 %v2230_v16, %v2194_v22  ;;  %v2232_v43 = vmul.f32 0.044715, %v2145_v39  ;;  %v2234_v49 = vmul.f32 0.044715, %v4426_v23 }
 0x776   : > { %v2233_v2 = vmul.f32 0.044715, %v4429_v42  ;;  %v4442_v54 = vmul.f32 0.5, %v2194_v22  ;;  %v2231_v57 = vmul.f32 0.044715, %v4432_v61  ;;  %v2245_v15 = vmul.f32 %v2229_v30, %v4422_v38 }
 0x777   : > { %v2260_v46 = vmul.f32 %v2244_v41, %v2141_v13  ;;  %v2262_v47 = vmul.f32 %v2246_v63, %v2194_v22  ;;  %v2248_v50 = vmul.f32 %v2232_v43, %v2145_v39  ;;  %v2250_v55 = vmul.f32 %v2234_v49, %v4426_v23 }
 0x778   : > { %v2150_v51 = vpop.f32.mrb[28].mxu1  ;;  %v2203_v20 = vpop.f32.mrb[28].mxu0  ;;  %v2235_v59 = vmul.f32 0.044715, %v4435_v31  ;;  %v2249_v7 = vmul.f32 %v2233_v2, %v4429_v42  ;;  %v2247_v9 = vmul.f32 %v2231_v57, %v4432_v61  ;;  %v2261_v32 = vmul.f32 %v2245_v15, %v4422_v38 }
 0x779   : > { %v2276_v3 = vadd.f32 %v2260_v46, %v2141_v13  ;;  %v2278_v40 = vadd.f32 %v2262_v47, %v2194_v22  ;;  %v2152_v44 = vpop.f32.mrb[29].mxu1  ;;  %v2205_v48 = vpop.f32.mrb[29].mxu0  ;;  %v2264_v53 = vmul.f32 %v2248_v50, %v2145_v39  ;;  %v4448_v29 = vadd.f32 %v2150_v51, %v4406_v24 }
 0x77a   : > { %v2154_v33 = vpop.f32.mrb[30].mxu1  ;;  %v2207_v34 = vpop.f32.mrb[30].mxu0  ;;  %v2266_v11 = vmul.f32 %v2250_v55, %v4426_v23  ;;  %v4454_v62 = vadd.f32 %v2203_v20, %v4410_v1  ;;  %v4459_v8 = vadd.f32 %v2152_v44, %v4415_v21  ;;  %v2251_v28 = vmul.f32 %v2235_v59, %v4435_v31 }
 0x77b   : > { %v2292_v56 = vmul.f32 0.7978846, %v2276_v3  ;;  %v2294_v4 = vmul.f32 0.7978846, %v2278_v40  ;;  %v2156_v12 = vpop.f32.mrb[31].mxu1  ;;  %v2209_v14 = vpop.f32.mrb[31].mxu0  ;;  %v2280_v17 = vadd.f32 %v2264_v53, %v2145_v39  ;;  %v4465_v22 = vadd.f32 %v2205_v48, %v4419_v6 }
 0x77c   : > { %v2282_v18 = vadd.f32 %v2266_v11, %v4426_v23  ;;  %v2236_v19 = vmul.f32 0.044715, %v4448_v29  ;;  %v2237_v13 = vmul.f32 0.044715, %v4459_v8  ;;  %v4468_v27 = vadd.f32 %v2154_v33, %v4406_v24 }
 0x77d   : > { %3526 = vtanh.f32 %v2292_v56  ;;  %v2296_v26 = vmul.f32 0.7978846, %v2280_v17  ;;  %v2265_v36 = vmul.f32 %v2249_v7, %v4429_v42  ;;  %v4473_v37 = vadd.f32 %v2207_v34, %v4410_v1 }
 0x77e   : > { %3528 = vtanh.f32 %v2294_v4  ;;  %v2298_v5 = vmul.f32 0.7978846, %v2282_v18  ;;  %v2252_v35 = vmul.f32 %v2236_v19, %v4448_v29  ;;  %v2238_v16 = vmul.f32 0.044715, %v4454_v62 }
 0x77f   : > { %3530 = vtanh.f32 %v2296_v26  ;;  %v2239_v25 = vmul.f32 0.044715, %v4465_v22  ;;  %v2216_v52 = vmul.f32 0.5, %v2145_v39  ;;  %v2253_v41 = vmul.f32 %v2237_v13, %v4459_v8 }
 0x780   : > { %3532 = vtanh.f32 %v2298_v5  ;;  %v4480_v24 = vadd.f32 %v2156_v12, %v4415_v21  ;;  %v4483_v63 = vadd.f32 %v2209_v14, %v4419_v6  ;;  %v2263_v43 = vmul.f32 %v2247_v9, %v4432_v61 }
 0x781   : > { %v2267_v1 = vmul.f32 %v2251_v28, %v4435_v31  ;;  %v2240_v46 = vmul.f32 0.044715, %v4468_v27  ;;  %v2242_v47 = vmul.f32 0.044715, %v4473_v37  ;;  %v2255_v49 = vmul.f32 %v2239_v25, %v4465_v22 }
 0x782   : > { %v2241_v39 = vmul.f32 0.044715, %v4480_v24  ;;  %v2243_v30 = vmul.f32 0.044715, %v4483_v63  ;;  %v2277_v21 = vadd.f32 %v2261_v32, %v4422_v38  ;;  %v2218_v50 = vmul.f32 0.5, %v4426_v23 }
 0x783   : > { %v2268_v6 = vmul.f32 %v2252_v35, %v4448_v29  ;;  %v2254_v2 = vmul.f32 %v2238_v16, %v4454_v62  ;;  %v2281_v51 = vadd.f32 %v2265_v36, %v4429_v42  ;;  %v2269_v20 = vmul.f32 %v2253_v41, %v4459_v8 }
 0x784   : > { %v2257_v3 = vmul.f32 %v2241_v39, %v4480_v24  ;;  %v2259_v40 = vmul.f32 %v2243_v30, %v4483_v63  ;;  %v2293_v55 = vmul.f32 0.7978846, %v2277_v21  ;;  %v2256_v48 = vmul.f32 %v2240_v46, %v4468_v27 }
 0x785   : > { %v2297_v57 = vmul.f32 0.7978846, %v2281_v51  ;;  %v2279_v53 = vadd.f32 %v2263_v43, %v4432_v61  ;;  %v2283_v23 = vadd.f32 %v2267_v1, %v4435_v31  ;;  %v2271_v33 = vmul.f32 %v2255_v49, %v4465_v22 }
 0x786   : > { %v2258_v34 = vmul.f32 %v2242_v47, %v4473_v37  ;;  %v2273_v56 = vmul.f32 %v2257_v3, %v4480_v24  ;;  %3534 = vtanh.f32 %v2293_v55  ;;  %v2270_v15 = vmul.f32 %v2254_v2, %v4454_v62 }
 0x787   : > { %v3527_v44 = vpop.eup %3526  ;;  %3536 = vtanh.f32 %v2297_v57  ;;  %v2295_v4 = vmul.f32 0.7978846, %v2279_v53  ;;  %v2299_v11 = vmul.f32 0.7978846, %v2283_v23  ;;  %v2275_v17 = vmul.f32 %v2259_v40, %v4483_v63 }
 0x788   : > { %v3529_v59 = vpop.eup %3528  ;;  %v2324_v12 = vadd.f32 1.0, %v3527_v44  ;;  %v2285_v18 = vadd.f32 %v2269_v20, %v4459_v8  ;;  %v2272_v9 = vmul.f32 %v2256_v48, %v4468_v27  ;;  %v2289_v28 = vadd.f32 %v2273_v56, %v4480_v24 }
 0x789   : > { %v3531_v14 = vpop.eup %3530  ;;  %v2326_v7 = vadd.f32 1.0, %v3529_v59  ;;  %3538 = vtanh.f32 %v2295_v4  ;;  %v2274_v5 = vmul.f32 %v2258_v34, %v4473_v37  ;;  %v2287_v25 = vadd.f32 %v2271_v33, %v4465_v22 }
 0x78a   : > { %v3533_v19 = vpop.eup %3532  ;;  %v2328_v26 = vadd.f32 1.0, %v3531_v14  ;;  %3540 = vtanh.f32 %v2299_v11  ;;  %v2301_v32 = vmul.f32 0.7978846, %v2285_v18  ;;  %v2340_v36 = vmul.f32 %v2324_v12, %v4437_v45 }
 0x78b   : > { %v2330_v13 = vadd.f32 1.0, %v3533_v19  ;;  %v2305_v16 = vmul.f32 0.7978846, %v2289_v28  ;;  %v2342_v41 = vmul.f32 %v2326_v7, %v4442_v54  ;;  %v2291_v1 = vadd.f32 %v2275_v17, %v4483_v63 }
 0x78c   : > { %v2344_v35 = vmul.f32 %v2328_v26, %v2216_v52  ;;  %3542 = vtanh.f32 %v2301_v32  ;;  %v2303_v47 = vmul.f32 0.7978846, %v2287_v25  ;;  %v2284_v30 = vadd.f32 %v2268_v6, %v4448_v29 }
 0x78d   : > { %v2346_v43 = vmul.f32 %v2330_v13, %v2218_v50  ;;  %3544 = vtanh.f32 %v2305_v16  ;;  %v2307_v39 = vmul.f32 0.7978846, %v2291_v1  ;;  %v2288_v21 = vadd.f32 %v2272_v9, %v4468_v27 }
 0x78e   : > { %v2356_v46 = vpack.c.bf16 %v2344_v35, %v2340_v36  ;;  %3546 = vtanh.f32 %v2303_v47  ;;  %v2286_v45 = vadd.f32 %v2270_v15, %v4454_v62  ;;  %v2300_v2 = vmul.f32 0.7978846, %v2284_v30 }
 0x78f   : > { %v2358_v49 = vpack.c.bf16 %v2346_v43, %v2342_v41  ;;  %3548 = vtanh.f32 %v2307_v39  ;;  %v2304_v54 = vmul.f32 0.7978846, %v2288_v21  ;;  %v2290_v50 = vadd.f32 %v2274_v5, %v4473_v37 }
 0x790   : > { %v3535_v52 = vpop.eup %3534  ;;  %v2213_v20 = vmul.f32 0.5, %v4422_v38  ;;  %v2302_v40 = vmul.f32 0.7978846, %v2286_v45  ;;  %v2217_v55 = vmul.f32 0.5, %v4429_v42  ;;  %3550 = vtanh.f32 %v2300_v2 }
 0x791   : > { %v3537_v51 = vpop.eup %3536  ;;  %v2325_v3 = vadd.f32 1.0, %v3535_v52  ;;  %v2306_v6 = vmul.f32 0.7978846, %v2290_v50  ;;  %3552 = vtanh.f32 %v2304_v54  ;;  %v2215_v33 = vmul.f32 0.5, %v4432_v61 }
 0x792   : > { %v2329_v44 = vadd.f32 1.0, %v3537_v51  ;;  %3554 = vtanh.f32 %v2302_v40  ;;  %v2219_v34 = vmul.f32 0.5, %v4435_v31  ;;  %v2221_v15 = vmul.f32 0.5, %v4459_v8 }
 0x793   : > { %v3539_v48 = vpop.eup %3538  ;;  %v2341_v53 = vmul.f32 %v2325_v3, %v2213_v20  ;;  %3556 = vtanh.f32 %v2306_v6  ;;  %v2225_v17 = vmul.f32 0.5, %v4480_v24  ;;  %v2223_v28 = vmul.f32 0.5, %v4465_v22 }
 0x794   : > { %v3541_v57 = vpop.eup %3540  ;;  %v2345_v23 = vmul.f32 %v2329_v44, %v2217_v55  ;;  %v2327_v59 = vadd.f32 1.0, %v3539_v48  ;;  %v2227_v5 = vmul.f32 0.5, %v4483_v63  ;;  %v2220_v41 = vmul.f32 0.5, %v4448_v29 }
 0x795   : > { %v2331_v56 = vadd.f32 1.0, %v3541_v57  ;;  %v2224_v43 = vmul.f32 0.5, %v4468_v27  ;;  %v2222_v22 = vmul.f32 0.5, %v4454_v62  ;;  %v2226_v30 = vmul.f32 0.5, %v4473_v37  ;;  %v2901_v62 = vld [vmem:[%s4605_s12] ss:$0 sm:$0xff] }
 0x796   : > { %v3543_v38 = vpop.eup %3542  ;;  %v2357_v4 = vpack.c.bf16 %v2345_v23, %v2341_v53  ;;  %v2343_v42 = vmul.f32 %v2327_v59, %v2215_v33 }
 0x797   : > { %v3545_v11 = vpop.eup %3544  ;;  %v2347_v12 = vmul.f32 %v2331_v56, %v2219_v34  ;;  %v2333_v14 = vadd.f32 1.0, %v3543_v38 }
 0x798   : > { %2659 = vmatprep.mubr.bf16.mxu1 %v2357_v4  ;;  %v2337_v7 = vadd.f32 1.0, %v3545_v11  ;;  %v3547_v18 = vpop.eup %3546 }
 0x799   : > { %v2359_v19 = vpack.c.bf16 %v2347_v12, %v2343_v42  ;;  %2660 = vmatmul.mubr.bf16.vlgmr.msra.gmra.mrb[32].mxu1 %v2356_v46  ;;  %v3549_v61 = vpop.eup %3548  ;;  %v2349_v9 = vmul.f32 %v2333_v14, %v2221_v15  ;;  %v2335_v26 = vadd.f32 1.0, %v3547_v18 }
 0x79a   : > { %v2353_v31 = vmul.f32 %v2337_v7, %v2225_v17  ;;  %v2339_v13 = vadd.f32 1.0, %v3549_v61  ;;  %v3551_v32 = vpop.eup %3550 }
 0x79b   : > { %2708 = vmatprep.mubr.bf16.mxu0 %v2359_v19  ;;  %v3553_v8 = vpop.eup %3552  ;;  %v2351_v35 = vmul.f32 %v2335_v26, %v2223_v28  ;;  %v2332_v16 = vadd.f32 1.0, %v3551_v32 }
 0x79c   : > { %2709 = vmatmul.mubr.bf16.vlgmr.msra.gmra.mrb[32].mxu0 %v2358_v49  ;;  %v2361_v36 = vpack.c.bf16 %v2353_v31, %v2349_v9  ;;  %v2355_v24 = vmul.f32 %v2339_v13, %v2227_v5  ;;  %v3555_v25 = vpop.eup %3554  ;;  %v2336_v1 = vadd.f32 1.0, %v3553_v8 }
 0x79d   : > { %v3557_v46 = vpop.eup %3556  ;;  %v2334_v63 = vadd.f32 1.0, %v3555_v25  ;;  %v2348_v39 = vmul.f32 %v2332_v16, %v2220_v41 }
 0x79e   : > { %2667 = vmatprep.mubr.bf16.mxu1 %v2361_v36  ;;  %v2363_v47 = vpack.c.bf16 %v2355_v24, %v2351_v35  ;;  %v2352_v49 = vmul.f32 %v2336_v1, %v2224_v43  ;;  %v2338_v21 = vadd.f32 1.0, %v3557_v46 }
 0x79f   : > { %v2350_v52 = vmul.f32 %v2334_v63, %v2222_v22 }
 0x7a0   : > { %2716 = vmatprep.mubr.bf16.mxu0 %v2363_v47  ;;  %v2360_v45 = vpack.c.bf16 %v2352_v49, %v2348_v39  ;;  %v2354_v2 = vmul.f32 %v2338_v21, %v2226_v30 }
 0x7a2   : > { %2668 = vmatmul.mubr.bf16.gmra.mrb[36].mxu1 %v2360_v45  ;;  %v2362_v29 = vpack.c.bf16 %v2354_v2, %v2350_v52 }
 0x7a4   : > { %2717 = vmatmul.mubr.bf16.gmra.mrb[36].mxu0 %v2362_v29 }
 0x86c   : > { %v3009_v27 = vpop.f32.mrb[32].mxu1 }
 0x86d   : > { %v3010_v54 = vpop.f32.mrb[33].mxu1 }
 0x86e   : > { %v3011_v50 = vadd.f32 %v3010_v54, %v3009_v27  ;;  %v3012_v51 = vpop.f32.mrb[34].mxu1 }
 0x86f   : > { %v3037_v20 = vpop.f32.mrb[32].mxu0  ;;  %v3013_v37 = vpop.f32.mrb[35].mxu1 }
 0x870   : > { %v2662_v3 = vadd.f32 %v3011_v50, %v2901_v62  ;;  %v3038_v40 = vpop.f32.mrb[33].mxu0  ;;  %v3014_v55 = vadd.f32 %v3013_v37, %v3012_v51 }
 0x871   : > { %v3039_v44 = vadd.f32 %v3038_v40, %v3037_v20  ;;  %v3040_v6 = vpop.f32.mrb[34].mxu0 }
 0x872   : > { %v2665_v48 = vadd.f32 %v3014_v55, %v2901_v62  ;;  %v3041_v57 = vpop.f32.mrb[35].mxu0 }
 0x873   : > { %v2711_v53 = vadd.f32 %v3039_v44, %v2662_v3  ;;  %v3042_v23 = vadd.f32 %v3041_v57, %v3040_v6 }
 0x875   : > { %v2725_v59 = vadd.f32 %v2711_v53, %v4174_v60  ;;  %v2714_v33 = vadd.f32 %v3042_v23, %v2665_v48  ;;  %v3015_v56 = vpop.f32.mrb[36].mxu1 }
 0x876   : > { %v3016_v38 = vpop.f32.mrb[37].mxu1 }
 0x877   : > { %2729 = vst [vmem:[%s433_s15] sm:$0xff] %v2725_v59  ;;  %v2726_v34 = vadd.f32 %v2714_v33, %v4177_v0  ;;  %v3043_v4 = vpop.f32.mrb[36].mxu0  ;;  %v3017_v11 = vadd.f32 %v3016_v38, %v3015_v56  ;;  %v3018_v42 = vpop.f32.mrb[38].mxu1 }
 0x878   : > { %v3044_v12 = vpop.f32.mrb[37].mxu0  ;;  %v3019_v14 = vpop.f32.mrb[39].mxu1 }
 0x879   : > { %2730 = vst [vmem:[%s433_s15 + $0x8] sm:$0xff] %v2726_v34  ;;  %v2670_v15 = vadd.f32 %v3017_v11, %v2901_v62  ;;  %v3045_v17 = vadd.f32 %v3044_v12, %v3043_v4  ;;  %v3046_v7 = vpop.f32.mrb[38].mxu0  ;;  %v3020_v18 = vadd.f32 %v3019_v14, %v3018_v42 }
 0x87a   : > { %v3047_v60 = vpop.f32.mrb[39].mxu0 }
 0x87b   : > { %v2719_v19 = vadd.f32 %v3045_v17, %v2670_v15  ;;  %v2673_v61 = vadd.f32 %v3020_v18, %v2901_v62  ;;  %v3048_v0 = vadd.f32 %v3047_v60, %v3046_v7 }
 0x87d   : > { %v2727_v9 = vadd.f32 %v2719_v19, %v4192_v58  ;;  %v2722_v31 = vadd.f32 %v3048_v0, %v2673_v61 }
 0x87f   : > { %2731 = vst [vmem:[%s433_s15 + $0x10] sm:$0xff] %v2727_v9  ;;  %v2728_v26 = vadd.f32 %v2722_v31, %v4184_v10 }
 0x881   : > { %2732 = vst [vmem:[%s433_s15 + $0x18] sm:$0xff] %v2728_v26 }
 0x882   : > { %3575 = shalt.err (!%p3572_p3)
}
 0x883   : > { %s3576_s17 = scalar_lea.hbm %s4548_s24, 512  ;;  %s3580_s23 = scalar_lea.hbm %s4606_s13, 1024 }
 0x884   : > { %p3577_p4 = scmp.ne.s32.totalorder %s4548_s24, %s3576_s17  ;;  %p3581_p9 = scmp.lt.u32.totalorder %s4548_s24, %s4606_s13 }
 0x885   : > { %p3582_p10 = scmp.lt.u32.totalorder %s3580_s23, %s3576_s17  ;;  %p3584_p12 = scmp.lt.u32.totalorder %s3576_s17, %s4548_s24 }
 0x886   : > { %p3578_p7 = pnand %p3577_p4, %p3741_p5 }
 0x887   : > { %p3583_p11 = por %p3582_p10, %p3581_p9 }
 0x888   : > { %p3579_p8 = pneg %p3578_p7 }
 0x889   : > { %p3585_p13 = por %p3584_p12, %p3583_p11 }
 0x88b   : > { %p3586_p0 = pnand %p3585_p13, %p3579_p8 }
 0x88d   : > { %3589 = shalt.err (!%p3586_p0)
}
 0x88e   : > { %s3631_s29 = smov 128   ;;  %s3632_s27 = smov 8  }
 0x88f   : > { %3161 = dma.vmem_to_hbm [thread:$0]  (%p3741_p5), %s4542_s20, 512, %s4548_s24, %s4552_s0, %s3631_s29, %s3631_s29, %s3632_s27  }
 0x890 PF: > { %p3167_p1 = scmp.ge.s32.totalorder %s3624_s28, 2  ;;  %s2762_s16 = sand.u32 1, %s3612_s25  }
 0x891   : > { %s2763_s17 = scalar_lea.sflag [#allocation3], %s2762_s16 }
 0x892   : > { %p3164_p2 = pnand %p3167_p1, %p3745_p6 }
 0x894   : > { %3607 = dma.done.wait (!%p3164_p2), %s2763_s17, 512  }
 0x895   : > { %3609 = vsyncadd (!%p3164_p2), %s2763_s17, 4294966784  ;;  %s4617_s15 = sld [smem:[#allocation5_spill]]  ;;  %s4618_s27 = sld [smem:[#allocation6_spill]] }
 0x896   : > { %p23_p3 = scmp.ge.s32.totalorder %s3728_s14, 4   ;;  %s4619_s25 = smov %s3616_s26 }
 0x897   : > { %s4621_s28 = smov %s3728_s14 }
 0x898   :  { %25 = sbr.rel (!%p23_p3) target bundleno = 5 (0x5), region = 107 }
 0x89b   : > { %s4620_s26 = smov %s4617_s15 }
 0x89f   :  { %2768 = vsyncpa [#allocation3], 1 }
 0x8a0   :  { %2770 = vsyncpa [#allocation3 + $0x1], 1 }

</bundles_post_ra>
